<compile_context>
chip_gen: v6e
topology: v6e:2x2x1
jax: 0.10.0
libtpu: 0.0.40
codegen_flags: <defaults>
</compile_context>

<pallas_src>
import math

import jax
import jax.numpy as jnp
from jax.experimental import pallas as pl
from jax.experimental.pallas import tpu as pltpu


def round_up(x, m):
    return (x + m - 1) // m * m


# ----------------------------------------------------------------------------
# Pallas kernel: whole forward pass for one batch tile.
# ----------------------------------------------------------------------------
def energy_predictor_kernel(
    z_ref,                 # (TM, z)    bf16
    x_ref,                 # (TM, d)    bf16
    m_ref,                 # (TM, d)    bf16
    w1z_ref, w1x_ref,      # (z, Hp), (d, Hp)  bf16   fused encoder layer 1
    b1_ref,                # (1, Hp)    f32
    w2_ref, b2_ref,        # (Hp, Hp) bf16, (1, Hp) f32   block-diag encoder L2
    wc1_ref, bc1_ref,      # (Hp, Hp) bf16, (1, Hp) f32   combiner L1
    wc2_ref, bc2_ref,      # (Hp, 1)  bf16, (1, 1)  f32   combiner L2 (H -> 1)
    out_ref,               # (TM, 1)    f32
):
    f32 = jnp.float32
    bf16 = jnp.bfloat16

    # Mask multiply rides the (under-used) VPU slot next to the MXU work.
    xm = x_ref[...] * m_ref[...]

    # Fused encoder layer 1: hz -> lanes [0:H), hx -> lanes [H:2H) of one slab.
    h = (jnp.dot(z_ref[...], w1z_ref[...], preferred_element_type=f32)
         + jnp.dot(xm, w1x_ref[...], preferred_element_type=f32)
         + b1_ref[...])
    h = jnp.maximum(h, 0.0)

    # Encoder layer 2 (block-diagonal over the two halves of the slab).
    h = jnp.dot(h.astype(bf16), w2_ref[...], preferred_element_type=f32) + b2_ref[...]
    h = jnp.maximum(h, 0.0)

    # Combiner layer 1: the slab already IS concat([hz, hx]).
    hc = jnp.dot(h.astype(bf16), wc1_ref[...], preferred_element_type=f32) + bc1_ref[...]
    hc = jnp.maximum(hc, 0.0)

    # Combiner layer 2: Hp -> 1.  Plain (TM,Hp)@(Hp,1) -> no activation
    # transpose through the XLU; output traffic is negligible.
    e = jnp.dot(hc.astype(bf16), wc2_ref[...], preferred_element_type=f32) + bc2_ref[...]
    out_ref[...] = e.astype(out_ref.dtype)


# ----------------------------------------------------------------------------
# Parameter init (Xavier uniform weights, zero biases) — deterministic.
# ----------------------------------------------------------------------------
def xavier_uniform(key, fan_in, fan_out, dtype=jnp.float32):
    bound = math.sqrt(6.0 / (fan_in + fan_out))
    # Stored as (in, out); the Xavier bound is symmetric in fan_in/fan_out so
    # this matches nn.init.xavier_uniform_ on the transposed PyTorch weight.
    return jax.random.uniform(key, (fan_in, fan_out), dtype, -bound, bound)


def init_params(key, z_size, distance_size, hidden_size):
    ks = jax.random.split(key, 6)
    H = hidden_size
    return dict(
        wz1=xavier_uniform(ks[0], z_size, H),        bz1=jnp.zeros((1, H), jnp.float32),
        wz2=xavier_uniform(ks[1], H, H),             bz2=jnp.zeros((1, H), jnp.float32),
        wi1=xavier_uniform(ks[2], distance_size, H), bi1=jnp.zeros((1, H), jnp.float32),
        wi2=xavier_uniform(ks[3], H, H),             bi2=jnp.zeros((1, H), jnp.float32),
        wc1=xavier_uniform(ks[4], 2 * H, H),         bc1=jnp.zeros((1, H), jnp.float32),
        wc2=xavier_uniform(ks[5], H, 1),             bc2=jnp.zeros((1, 1), jnp.float32),
    )


# ----------------------------------------------------------------------------
# Pack per-layer params into one lane-padded hidden slab (Hp = round_up(2H,128)).
# Padded rows/cols are zero and ReLU(0)=0, so the packing is exact; the only
# numerical deviation comes from bf16 matmul operands.
# ----------------------------------------------------------------------------
def pack_params(params):
    f32, bf16 = jnp.float32, jnp.bfloat16
    z = params["wz1"].shape[0]
    d = params["wi1"].shape[0]
    H = params["wz1"].shape[1]
    Hp = round_up(2 * H, 128)          # one slab holds [hz | hx]

    W1z = jnp.zeros((z, Hp), f32).at[:, :H].set(params["wz1"])
    W1x = jnp.zeros((d, Hp), f32).at[:, H:2 * H].set(params["wi1"])
    b1 = (jnp.zeros((1, Hp), f32)
          .at[:, :H].set(params["bz1"])
          .at[:, H:2 * H].set(params["bi1"]))

    W2 = (jnp.zeros((Hp, Hp), f32)
          .at[:H, :H].set(params["wz2"])
          .at[H:2 * H, H:2 * H].set(params["wi2"]))
    b2 = (jnp.zeros((1, Hp), f32)
          .at[:, :H].set(params["bz2"])
          .at[:, H:2 * H].set(params["bi2"]))

    Wc1 = jnp.zeros((Hp, Hp), f32).at[:2 * H, :H].set(params["wc1"])
    bc1 = jnp.zeros((1, Hp), f32).at[:, :H].set(params["bc1"])

    wc2 = jnp.zeros((Hp, 1), f32).at[:H, :].set(params["wc2"])
    bc2 = params["bc2"].reshape(1, 1).astype(f32)

    return dict(
        W1z=W1z.astype(bf16), W1x=W1x.astype(bf16), b1=b1,
        W2=W2.astype(bf16), b2=b2,
        Wc1=Wc1.astype(bf16), bc1=bc1,
        wc2=wc2.astype(bf16), bc2=bc2,
    )


# ----------------------------------------------------------------------------
# Wrapper around pallas_call (batch-tiled, weights resident).
# ----------------------------------------------------------------------------
def energy_predictor_forward(Z, input_data, mask, packed, *, tile_m=2048):
    B, z = Z.shape
    d = input_data.shape[1]
    Hp = packed["W2"].shape[0]

    # Large tile to amortize the ~0.35us/grid-step overhead, but aim for >=2
    # grid steps so the "parallel" batch axis can split across v7x's 2 TCs.
    TM = min(tile_m, round_up(pl.cdiv(B, 2), 256))
    num_tiles = pl.cdiv(B, TM)
    B_pad = num_tiles * TM

    bf16 = jnp.bfloat16
    Zb, Xb, Mb = Z.astype(bf16), input_data.astype(bf16), mask.astype(bf16)
    if B_pad != B:
        pad = ((0, B_pad - B), (0, 0))
        Zb, Xb, Mb = jnp.pad(Zb, pad), jnp.pad(Xb, pad), jnp.pad(Mb, pad)

    flops = 2 * B_pad * (z * Hp + d * Hp + 2 * Hp * Hp + Hp)
    bytes_accessed = (
        2 * B_pad * (z + 2 * d)                       # bf16 batch inputs
        + 2 * ((z + d) * Hp + 2 * Hp * Hp + Hp)       # bf16 weights
        + 4 * (3 * Hp + 1)                            # f32 biases
        + 4 * B_pad                                   # f32 output
    )

    batch_spec = lambda cols: pl.BlockSpec((TM, cols), lambda i: (i, 0))
    weight_spec = lambda shape: pl.BlockSpec(shape, lambda i: (0, 0))

    out = pl.pallas_call(
        energy_predictor_kernel,
        out_shape=jax.ShapeDtypeStruct((B_pad, 1), jnp.float32),
        grid=(num_tiles,),
        in_specs=[
            batch_spec(z),                 # Z tile
            batch_spec(d),                 # input tile
            batch_spec(d),                 # mask tile
            weight_spec((z, Hp)),          # W1z   (VMEM-resident)
            weight_spec((d, Hp)),          # W1x
            weight_spec((1, Hp)),          # b1
            weight_spec((Hp, Hp)),         # W2
            weight_spec((1, Hp)),          # b2
            weight_spec((Hp, Hp)),         # Wc1
            weight_spec((1, Hp)),          # bc1
            weight_spec((Hp, 1)),          # wc2
            weight_spec((1, 1)),           # bc2
        ],
        out_specs=pl.BlockSpec((TM, 1), lambda i: (i, 0)),
        compiler_params=pltpu.CompilerParams(
            dimension_semantics=("parallel",),
            vmem_limit_bytes=32 * 1024 * 1024,   # conservative for v7x's 64 MiB
        ),
        cost_estimate=pl.CostEstimate(
            flops=flops, transcendentals=0, bytes_accessed=bytes_accessed),
    )(Zb, Xb, Mb,
      packed["W1z"], packed["W1x"], packed["b1"],
      packed["W2"], packed["b2"],
      packed["Wc1"], packed["bc1"],
      packed["wc2"], packed["bc2"])

    return out[:B]


# Pure-JAX f32 reference (mirrors the PyTorch module) for sanity checking.
def energy_predictor_ref(Z, input_data, mask, params):
    relu = lambda v: jnp.maximum(v, 0.0)
    hz = relu(Z @ params["wz1"] + params["bz1"])
    hz = relu(hz @ params["wz2"] + params["bz2"])
    x = input_data * mask
    hx = relu(x @ params["wi1"] + params["bi1"])
    hx = relu(hx @ params["wi2"] + params["bi2"])
    comb = jnp.concatenate([hz, hx], axis=1)
    hc = relu(comb @ params["wc1"] + params["bc1"])
    return hc @ params["wc2"] + params["bc2"]


if __name__ == "__main__":
    # Small synthetic sizes consistent with the module (positions mode).
    # TODO(synk): 'forces' mode uses the identical kernel with the input
    # encoder packed from forces_size-wide weights; only positions is exercised.
    batch = 2
    z_size = 16          # max_atoms one-hot-ish width
    distance_size = 64   # flattened distance matrix
    hidden_size = 32

    key = jax.random.PRNGKey(0)
    kp, kz, kx, km = jax.random.split(key, 4)

    params = init_params(kp, z_size, distance_size, hidden_size)
    packed = pack_params(params)

    Z = jax.random.normal(kz, (batch, z_size), jnp.float32)
    input_data = jax.random.normal(kx, (batch, distance_size), jnp.float32)
    mask = (jax.random.uniform(km, (batch, distance_size)) > 0.2).astype(jnp.float32)

    fwd = jax.jit(energy_predictor_forward)
    out = jax.block_until_ready(fwd(Z, input_data, mask, packed))

    ref = energy_predictor_ref(Z, input_data, mask, params)
    assert out.shape == (batch, 1)
    # bf16 matmul operands (f32 accumulation) vs. the pure-f32 reference.
    assert jnp.allclose(out, ref, atol=5e-2, rtol=5e-2), (out, ref)

    print("KERNEL_OK")
</pallas_src>

<mosaic_0001>
module attributes {stable_mosaic.version = 11 : i64} {
  func.func @energy_predictor_kernel(%arg0: i32, %arg1: memref<256x16xbf16, #tpu.memory_space<vmem>>, %arg2: memref<256x64xbf16, #tpu.memory_space<vmem>>, %arg3: memref<256x64xbf16, #tpu.memory_space<vmem>>, %arg4: memref<16x128xbf16, #tpu.memory_space<vmem>>, %arg5: memref<64x128xbf16, #tpu.memory_space<vmem>>, %arg6: memref<1x128xf32, #tpu.memory_space<vmem>>, %arg7: memref<128x128xbf16, #tpu.memory_space<vmem>>, %arg8: memref<1x128xf32, #tpu.memory_space<vmem>>, %arg9: memref<128x128xbf16, #tpu.memory_space<vmem>>, %arg10: memref<1x128xf32, #tpu.memory_space<vmem>>, %arg11: memref<128x1xbf16, #tpu.memory_space<vmem>>, %arg12: memref<1x1xf32, #tpu.memory_space<vmem>>, %arg13: memref<256x1xf32, #tpu.memory_space<vmem>>) attributes {dimension_semantics = [#tpu.dimension_semantics<parallel>], iteration_bounds = array<i64: 1>, scalar_prefetch = 0 : i64, scratch_operands = 0 : i64, tpu.core_type = #tpu.core_type<tc>, window_params = [{transform_indices = @transform_0, window_bounds = array<i64: 256, 16>}, {transform_indices = @transform_1, window_bounds = array<i64: 256, 64>}, {transform_indices = @transform_2, window_bounds = array<i64: 256, 64>}, {pipeline_mode = #tpu.pipeline_mode<synchronous>, transform_indices = @transform_3, window_bounds = array<i64: 16, 128>}, {pipeline_mode = #tpu.pipeline_mode<synchronous>, transform_indices = @transform_4, window_bounds = array<i64: 64, 128>}, {pipeline_mode = #tpu.pipeline_mode<synchronous>, transform_indices = @transform_5, window_bounds = array<i64: 1, 128>}, {pipeline_mode = #tpu.pipeline_mode<synchronous>, transform_indices = @transform_6, window_bounds = array<i64: 128, 128>}, {pipeline_mode = #tpu.pipeline_mode<synchronous>, transform_indices = @transform_7, window_bounds = array<i64: 1, 128>}, {pipeline_mode = #tpu.pipeline_mode<synchronous>, transform_indices = @transform_8, window_bounds = array<i64: 128, 128>}, {pipeline_mode = #tpu.pipeline_mode<synchronous>, transform_indices = @transform_9, window_bounds = array<i64: 1, 128>}, {pipeline_mode = #tpu.pipeline_mode<synchronous>, transform_indices = @transform_10, window_bounds = array<i64: 128, 1>}, {pipeline_mode = #tpu.pipeline_mode<synchronous>, transform_indices = @transform_11, window_bounds = array<i64: 1, 1>}, {transform_indices = @transform_12, window_bounds = array<i64: 256, 1>}]} {
    %c0 = arith.constant 0 : index
    %c0_0 = arith.constant 0 : index
    %0 = vector.load %arg2[%c0, %c0_0] : memref<256x64xbf16, #tpu.memory_space<vmem>>, vector<256x64xbf16>
    %c0_1 = arith.constant 0 : index
    %c0_2 = arith.constant 0 : index
    %1 = vector.load %arg3[%c0_1, %c0_2] : memref<256x64xbf16, #tpu.memory_space<vmem>>, vector<256x64xbf16>
    %2 = arith.mulf %0, %1 : vector<256x64xbf16>
    %c0_3 = arith.constant 0 : index
    %c0_4 = arith.constant 0 : index
    %3 = vector.load %arg1[%c0_3, %c0_4] : memref<256x16xbf16, #tpu.memory_space<vmem>>, vector<256x16xbf16>
    %c0_5 = arith.constant 0 : index
    %c0_6 = arith.constant 0 : index
    %4 = vector.load %arg4[%c0_5, %c0_6] : memref<16x128xbf16, #tpu.memory_space<vmem>>, vector<16x128xbf16>
    %cst = arith.constant dense<0.000000e+00> : vector<256x128xf32>
    %5 = tpu.matmul %3, %4, %cst {dimension_numbers = #tpu.dot_dimension_numbers<[1], [0], [0], [1], [0, 0, 1, 1], [], []>} : vector<256x16xbf16>, vector<16x128xbf16>, vector<256x128xf32> -> vector<256x128xf32>
    %c0_7 = arith.constant 0 : index
    %c0_8 = arith.constant 0 : index
    %6 = vector.load %arg5[%c0_7, %c0_8] : memref<64x128xbf16, #tpu.memory_space<vmem>>, vector<64x128xbf16>
    %cst_9 = arith.constant dense<0.000000e+00> : vector<256x128xf32>
    %7 = tpu.matmul %2, %6, %cst_9 {dimension_numbers = #tpu.dot_dimension_numbers<[1], [0], [0], [1], [0, 0, 1, 1], [], []>} : vector<256x64xbf16>, vector<64x128xbf16>, vector<256x128xf32> -> vector<256x128xf32>
    %8 = arith.addf %5, %7 : vector<256x128xf32>
    %c0_10 = arith.constant 0 : index
    %c0_11 = arith.constant 0 : index
    %9 = vector.load %arg6[%c0_10, %c0_11] : memref<1x128xf32, #tpu.memory_space<vmem>>, vector<1x128xf32>
    %10 = vector.broadcast %9 : vector<1x128xf32> to vector<256x128xf32>
    %11 = arith.addf %8, %10 : vector<256x128xf32>
    %cst_12 = arith.constant 0.000000e+00 : f32
    %12 = vector.broadcast %cst_12 : f32 to vector<256x128xf32>
    %13 = arith.maximumf %11, %12 : vector<256x128xf32>
    %14 = arith.truncf %13 : vector<256x128xf32> to vector<256x128xbf16>
    %c0_13 = arith.constant 0 : index
    %c0_14 = arith.constant 0 : index
    %15 = vector.load %arg7[%c0_13, %c0_14] : memref<128x128xbf16, #tpu.memory_space<vmem>>, vector<128x128xbf16>
    %cst_15 = arith.constant dense<0.000000e+00> : vector<256x128xf32>
    %16 = tpu.matmul %14, %15, %cst_15 {dimension_numbers = #tpu.dot_dimension_numbers<[1], [0], [0], [1], [0, 0, 1, 1], [], []>} : vector<256x128xbf16>, vector<128x128xbf16>, vector<256x128xf32> -> vector<256x128xf32>
    %c0_16 = arith.constant 0 : index
    %c0_17 = arith.constant 0 : index
    %17 = vector.load %arg8[%c0_16, %c0_17] : memref<1x128xf32, #tpu.memory_space<vmem>>, vector<1x128xf32>
    %18 = vector.broadcast %17 : vector<1x128xf32> to vector<256x128xf32>
    %19 = arith.addf %16, %18 : vector<256x128xf32>
    %cst_18 = arith.constant 0.000000e+00 : f32
    %20 = vector.broadcast %cst_18 : f32 to vector<256x128xf32>
    %21 = arith.maximumf %19, %20 : vector<256x128xf32>
    %22 = arith.truncf %21 : vector<256x128xf32> to vector<256x128xbf16>
    %c0_19 = arith.constant 0 : index
    %c0_20 = arith.constant 0 : index
    %23 = vector.load %arg9[%c0_19, %c0_20] : memref<128x128xbf16, #tpu.memory_space<vmem>>, vector<128x128xbf16>
    %cst_21 = arith.constant dense<0.000000e+00> : vector<256x128xf32>
    %24 = tpu.matmul %22, %23, %cst_21 {dimension_numbers = #tpu.dot_dimension_numbers<[1], [0], [0], [1], [0, 0, 1, 1], [], []>} : vector<256x128xbf16>, vector<128x128xbf16>, vector<256x128xf32> -> vector<256x128xf32>
    %c0_22 = arith.constant 0 : index
    %c0_23 = arith.constant 0 : index
    %25 = vector.load %arg10[%c0_22, %c0_23] : memref<1x128xf32, #tpu.memory_space<vmem>>, vector<1x128xf32>
    %26 = vector.broadcast %25 : vector<1x128xf32> to vector<256x128xf32>
    %27 = arith.addf %24, %26 : vector<256x128xf32>
    %cst_24 = arith.constant 0.000000e+00 : f32
    %28 = vector.broadcast %cst_24 : f32 to vector<256x128xf32>
    %29 = arith.maximumf %27, %28 : vector<256x128xf32>
    %30 = arith.truncf %29 : vector<256x128xf32> to vector<256x128xbf16>
    %c0_25 = arith.constant 0 : index
    %c0_26 = arith.constant 0 : index
    %31 = vector.load %arg11[%c0_25, %c0_26] : memref<128x1xbf16, #tpu.memory_space<vmem>>, vector<128x1xbf16>
    %cst_27 = arith.constant dense<0.000000e+00> : vector<256x1xf32>
    %32 = tpu.matmul %30, %31, %cst_27 {dimension_numbers = #tpu.dot_dimension_numbers<[1], [0], [0], [1], [0, 0, 1, 1], [], []>} : vector<256x128xbf16>, vector<128x1xbf16>, vector<256x1xf32> -> vector<256x1xf32>
    %c0_28 = arith.constant 0 : index
    %c0_29 = arith.constant 0 : index
    %33 = vector.load %arg12[%c0_28, %c0_29] : memref<1x1xf32, #tpu.memory_space<vmem>>, vector<1x1xf32>
    %34 = vector.broadcast %33 : vector<1x1xf32> to vector<256x1xf32>
    %35 = arith.addf %32, %34 : vector<256x1xf32>
    %c0_30 = arith.constant 0 : index
    %c0_31 = arith.constant 0 : index
    %36 = vector.load %arg13[%c0_30, %c0_31] : memref<256x1xf32, #tpu.memory_space<vmem>>, vector<256x1xf32>
    tpu.vector_store %arg13[%c0_30, %c0_31], %35 {strides = array<i32>} : memref<256x1xf32, #tpu.memory_space<vmem>>, vector<256x1xf32>,
    return
  }
  func.func @transform_0(%arg0: i32) -> (i32, i32) {
    %c0_i32 = arith.constant 0 : i32
    %c0_i32_0 = arith.constant 0 : i32
    return %arg0, %c0_i32 : i32, i32
  }
  func.func @transform_1(%arg0: i32) -> (i32, i32) {
    %c0_i32 = arith.constant 0 : i32
    %c0_i32_0 = arith.constant 0 : i32
    return %arg0, %c0_i32 : i32, i32
  }
  func.func @transform_2(%arg0: i32) -> (i32, i32) {
    %c0_i32 = arith.constant 0 : i32
    %c0_i32_0 = arith.constant 0 : i32
    return %arg0, %c0_i32 : i32, i32
  }
  func.func @transform_3(%arg0: i32) -> (i32, i32) {
    %c0_i32 = arith.constant 0 : i32
    %c0_i32_0 = arith.constant 0 : i32
    %c0_i32_1 = arith.constant 0 : i32
    return %c0_i32, %c0_i32_0 : i32, i32
  }
  func.func @transform_4(%arg0: i32) -> (i32, i32) {
    %c0_i32 = arith.constant 0 : i32
    %c0_i32_0 = arith.constant 0 : i32
    %c0_i32_1 = arith.constant 0 : i32
    return %c0_i32, %c0_i32_0 : i32, i32
  }
  func.func @transform_5(%arg0: i32) -> (i32, i32) {
    %c0_i32 = arith.constant 0 : i32
    %c0_i32_0 = arith.constant 0 : i32
    %c0_i32_1 = arith.constant 0 : i32
    return %c0_i32, %c0_i32_0 : i32, i32
  }
  func.func @transform_6(%arg0: i32) -> (i32, i32) {
    %c0_i32 = arith.constant 0 : i32
    %c0_i32_0 = arith.constant 0 : i32
    %c0_i32_1 = arith.constant 0 : i32
    return %c0_i32, %c0_i32_0 : i32, i32
  }
  func.func @transform_7(%arg0: i32) -> (i32, i32) {
    %c0_i32 = arith.constant 0 : i32
    %c0_i32_0 = arith.constant 0 : i32
    %c0_i32_1 = arith.constant 0 : i32
    return %c0_i32, %c0_i32_0 : i32, i32
  }
  func.func @transform_8(%arg0: i32) -> (i32, i32) {
    %c0_i32 = arith.constant 0 : i32
    %c0_i32_0 = arith.constant 0 : i32
    %c0_i32_1 = arith.constant 0 : i32
    return %c0_i32, %c0_i32_0 : i32, i32
  }
  func.func @transform_9(%arg0: i32) -> (i32, i32) {
    %c0_i32 = arith.constant 0 : i32
    %c0_i32_0 = arith.constant 0 : i32
    %c0_i32_1 = arith.constant 0 : i32
    return %c0_i32, %c0_i32_0 : i32, i32
  }
  func.func @transform_10(%arg0: i32) -> (i32, i32) {
    %c0_i32 = arith.constant 0 : i32
    %c0_i32_0 = arith.constant 0 : i32
    %c0_i32_1 = arith.constant 0 : i32
    return %c0_i32, %c0_i32_0 : i32, i32
  }
  func.func @transform_11(%arg0: i32) -> (i32, i32) {
    %c0_i32 = arith.constant 0 : i32
    %c0_i32_0 = arith.constant 0 : i32
    %c0_i32_1 = arith.constant 0 : i32
    return %c0_i32, %c0_i32_0 : i32, i32
  }
  func.func @transform_12(%arg0: i32) -> (i32, i32) {
    %c0_i32 = arith.constant 0 : i32
    %c0_i32_0 = arith.constant 0 : i32
    return %arg0, %c0_i32 : i32, i32
  }
}

</mosaic_0001>

<bundles_post_ra>
// kernel: energy_predictor_forward.1
= control target key start
LH: loop header
LB: loop body
LE: loop exit
PB: predicated region body
PF: predicated region fallthrough
CT: control target
= control target key end

     0   :  { %vm582_vm0 = vcmask 130048   ;;  %vm286_vm1 = vcmask 523264   ;;  %vm1671_vm2 = vcmask 7168   ;;  %s2899_s4 = inlined_call_operand.vmem [shape: bf16[64,128], index: 4, kind: input, shape index: {}]   ;;  %s2900_s3 = inlined_call_operand.vmem [shape: bf16[16,128], index: 3, kind: input, shape index: {}]   ;;  %s2901_s0 = inlined_call_operand.vmem [shape: bf16[256,16], index: 0, kind: input, shape index: {}]   ;;  %s2902_s1 = inlined_call_operand.vmem [shape: bf16[256,64], index: 1, kind: input, shape index: {}]   ;;  %s2903_s2 = inlined_call_operand.vmem [shape: bf16[256,64], index: 2, kind: input, shape index: {}]   ;;  %s2904_s6 = inlined_call_operand.vmem [shape: bf16[128,128], index: 6, kind: input, shape index: {}]   ;;  %s2905_s8 = inlined_call_operand.vmem [shape: bf16[128,128], index: 8, kind: input, shape index: {}]   ;;  %s2906_s5 = inlined_call_operand.vmem [shape: f32[1,128], index: 5, kind: input, shape index: {}]   ;;  %s2907_s10 = inlined_call_operand.vmem [shape: bf16[128,1], index: 10, kind: input, shape index: {}]   ;;  %s2908_s7 = inlined_call_operand.vmem [shape: f32[1,128], index: 7, kind: input, shape index: {}]   ;;  %s2909_s11 = inlined_call_operand.<no memory space> [shape: f32[1,1], index: 11, kind: input, shape index: {}]   ;;  %s2910_s9 = inlined_call_operand.vmem [shape: f32[1,128], index: 9, kind: input, shape index: {}]   ;;  %s2911_s12 = inlined_call_operand.vmem [shape: f32[256,1], index: 12, kind: output, shape index: {}]  }
   0x1   :  { %v2148_v0 = vld [vmem:[%s2899_s4 + $0x18] sm:$0xff]   ;;  %v2149_v1 = vld [vmem:[%s2899_s4 + $0x10] sm:$0xff]   ;;  %v2150_v2 = vld [vmem:[%s2900_s3] sm:$0xff]  }
   0x2   :  { %1914 = vmatprep.subr.bf16.mxu0 %v2148_v0  ;;  %v2151_v3 = vld [vmem:[%s2899_s4 + $0x8] sm:$0xff]   ;;  %1954 = vmatprep.subr.bf16.mxu1 %v2150_v2  ;;  %v2152_v4 = vld [vmem:[%s2901_s0] sm:$0xff]   ;;  %v2155_v19 = vld [vmem:[%s2901_s0 + $0x10] sm:$0xff]  }
   0x3   :  { %1915 = vmatpush3.bf16.msra.mxu0 %v2148_v0  ;;  %1955 = vmatpush3.bf16.msra.mxu1 %v2150_v2  ;;  %v2153_v5 = vld [vmem:[%s2901_s0 + $0x8] sm:$0xff]   ;;  %v2154_v6 = vld [vmem:[%s2899_s4] sm:$0xff]   ;;  %v2156_v21 = vld [vmem:[%s2901_s0 + $0x18] sm:$0xff]  }
   0x4   :  { %1916 = vmatprep.subr.bf16.mxu0 %v2149_v1  ;;  %1956 = vmatprep.mubr.msk.bf16.mxu1 %vm582_vm0, %v2152_v4  ;;  %v44_v7 = vld [vmem:[%s2902_s1] sm:$0xf]  ;;  %v45_v8 = vld [vmem:[%s2902_s1 + $0x4] sm:$0xf]  ;;  %v46_v12 = vld [vmem:[%s2902_s1 + $0x8] sm:$0xf] }
   0x5   :  { %v76_v9 = vld [vmem:[%s2903_s2] sm:$0xf]  ;;  %v77_v10 = vld [vmem:[%s2903_s2 + $0x4] sm:$0xf]  ;;  %v47_v13 = vld [vmem:[%s2902_s1 + $0xc] sm:$0xf] }
   0x6   :  { %1957 = vmatmul.mubr.msk.bf16.vlgmr.msra.gmra.mxu1 %vm582_vm0, %v2153_v5  ;;  %v108_v11 = vmul.bf16 %v76_v9, %v44_v7  ;;  %v109_v14 = vmul.bf16 %v77_v10, %v45_v8  ;;  %v78_v15 = vld [vmem:[%s2903_s2 + $0x8] sm:$0xf]  ;;  %v79_v16 = vld [vmem:[%s2903_s2 + $0xc] sm:$0xf]  ;;  %v48_v22 = vld [vmem:[%s2902_s1 + $0x10] sm:$0xf] }
   0x7   :  { %1917 = vmatpush3.bf16.msra.mxu0 %v2149_v1  ;;  %v110_v17 = vmul.bf16 %v78_v15, %v46_v12  ;;  %v111_v18 = vmul.bf16 %v79_v16, %v47_v13  ;;  %1960 = vmatprep.mubr.msk.bf16.mxu1 %vm582_vm0, %v2155_v19  ;;  %v49_v23 = vld [vmem:[%s2902_s1 + $0x14] sm:$0xf]  ;;  %v80_v24 = vld [vmem:[%s2903_s2 + $0x10] sm:$0xf]  ;;  %v50_v28 = vld [vmem:[%s2902_s1 + $0x18] sm:$0xf] }
   0x8   :  { %1918 = vmatprep.subr.bf16.mxu0 %v2151_v3  ;;  %v1708_v20 = vcombine.low %v108_v11, %v109_v14  ;;  %v81_v25 = vld [vmem:[%s2903_s2 + $0x14] sm:$0xf]  ;;  %v112_v26 = vmul.bf16 %v80_v24, %v48_v22  ;;  %v51_v29 = vld [vmem:[%s2902_s1 + $0x1c] sm:$0xf]  ;;  %v82_v30 = vld [vmem:[%s2903_s2 + $0x18] sm:$0xf] }
   0x9   :  { %v113_v27 = vmul.bf16 %v81_v25, %v49_v23  ;;  %v1709_v31 = vcombine.low %v110_v17, %v111_v18  ;;  %v83_v32 = vld [vmem:[%s2903_s2 + $0x1c] sm:$0xf]  ;;  %v2157_v34 = vld [vmem:[%s2901_s0 + $0x20] sm:$0xff]   ;;  %v114_v39 = vmul.bf16 %v82_v30, %v50_v28  ;;  %v2158_v43 = vld [vmem:[%s2901_s0 + $0x28] sm:$0xff]  }
   0xa   :  { %1922 = vmatprep.mubr.msk.bf16.mxu0 %vm286_vm1, %v1708_v20  ;;  %v52_v35 = vld [vmem:[%s2902_s1 + $0x20] sm:$0xf]  ;;  %v53_v36 = vld [vmem:[%s2902_s1 + $0x24] sm:$0xf]  ;;  %v115_v40 = vmul.bf16 %v83_v32, %v51_v29  ;;  %v54_v44 = vld [vmem:[%s2902_s1 + $0x28] sm:$0xf] }
   0xb   :  { %1919 = vmatpush3.bf16.msra.mxu0 %v2151_v3  ;;  %v1710_v33 = vcombine.low %v112_v26, %v113_v27  ;;  %v84_v37 = vld [vmem:[%s2903_s2 + $0x20] sm:$0xf]  ;;  %v85_v38 = vld [vmem:[%s2903_s2 + $0x24] sm:$0xf]  ;;  %v55_v45 = vld [vmem:[%s2902_s1 + $0x2c] sm:$0xf] }
   0xc   :  { %1920 = vmatprep.subr.bf16.mxu0 %v2154_v6  ;;  %v116_v41 = vmul.bf16 %v84_v37, %v52_v35  ;;  %v117_v42 = vmul.bf16 %v85_v38, %v53_v36  ;;  %v2159_v46 = vld [vmem:[%s2901_s0 + $0x30] sm:$0xff]   ;;  %v1711_v47 = vcombine.low %v114_v39, %v115_v40  ;;  %v86_v48 = vld [vmem:[%s2903_s2 + $0x28] sm:$0xf]  ;;  %v87_v49 = vld [vmem:[%s2903_s2 + $0x2c] sm:$0xf] }
   0xd   :  { %v56_v50 = vld [vmem:[%s2902_s1 + $0x30] sm:$0xf]  ;;  %v57_v52 = vld [vmem:[%s2902_s1 + $0x34] sm:$0xf]  ;;  %v118_v55 = vmul.bf16 %v86_v48, %v54_v44  ;;  %v119_v56 = vmul.bf16 %v87_v49, %v55_v45  ;;  %v2160_v59 = vld [vmem:[%s2901_s0 + $0x38] sm:$0xff]  }
   0xe   :  { %1961 = vmatmul.mubr.msk.bf16.gmra.mxu1 %vm582_vm0, %v2156_v21  ;;  %v1712_v51 = vcombine.low %v116_v41, %v117_v42  ;;  %v88_v53 = vld [vmem:[%s2903_s2 + $0x30] sm:$0xf]  ;;  %v89_v54 = vld [vmem:[%s2903_s2 + $0x34] sm:$0xf]  ;;  %v2161_v60 = vld [vmem:[%s2901_s0 + $0x40] sm:$0xff]  }
   0xf   :  { %1921 = vmatpush3.bf16.msra.mxu0 %v2154_v6  ;;  %1964 = vmatprep.mubr.msk.bf16.mxu1 %vm582_vm0, %v2157_v34  ;;  %v120_v57 = vmul.bf16 %v88_v53, %v56_v50  ;;  %v121_v58 = vmul.bf16 %v89_v54, %v57_v52  ;;  %v1713_v61 = vcombine.low %v118_v55, %v119_v56  ;;  %v58_v62 = vld [vmem:[%s2902_s1 + $0x38] sm:$0xf]  ;;  %v59_v63 = vld [vmem:[%s2902_s1 + $0x3c] sm:$0xf]  ;;  %v60_v3 = vld [vmem:[%s2902_s1 + $0x40] sm:$0xf] }
  0x10   :  { %v90_v1 = vld [vmem:[%s2903_s2 + $0x38] sm:$0xf]  ;;  %v91_v2 = vld [vmem:[%s2903_s2 + $0x3c] sm:$0xf]  ;;  %v61_v4 = vld [vmem:[%s2902_s1 + $0x44] sm:$0xf] }
  0x11   :  { %v1714_v0 = vcombine.low %v120_v57, %v121_v58  ;;  %v92_v5 = vld [vmem:[%s2903_s2 + $0x40] sm:$0xf]  ;;  %v93_v6 = vld [vmem:[%s2903_s2 + $0x44] sm:$0xf]  ;;  %v122_v7 = vmul.bf16 %v90_v1, %v58_v62  ;;  %v123_v8 = vmul.bf16 %v91_v2, %v59_v63  ;;  %v2162_v11 = vld [vmem:[%s2901_s0 + $0x48] sm:$0xff]  }
  0x12   :  { %1923 = vmatmul.mubr.msk.bf16.vlgmr.msra.gmra.mxu0 %vm286_vm1, %v1709_v31  ;;  %v124_v9 = vmul.bf16 %v92_v5, %v60_v3  ;;  %v125_v10 = vmul.bf16 %v93_v6, %v61_v4  ;;  %v62_v12 = vld [vmem:[%s2902_s1 + $0x48] sm:$0xf]  ;;  %v63_v13 = vld [vmem:[%s2902_s1 + $0x4c] sm:$0xf]  ;;  %v2163_v14 = vld [vmem:[%s2901_s0 + $0x50] sm:$0xff]  }
  0x13   :  { %1926 = vmatprep.mubr.msk.bf16.mxu0 %vm286_vm1, %v1710_v33  ;;  %v1715_v15 = vcombine.low %v122_v7, %v123_v8  ;;  %v94_v16 = vld [vmem:[%s2903_s2 + $0x48] sm:$0xf]  ;;  %v95_v18 = vld [vmem:[%s2903_s2 + $0x4c] sm:$0xf]  ;;  %v64_v19 = vld [vmem:[%s2902_s1 + $0x50] sm:$0xf] }
  0x14   :  { %v1716_v17 = vcombine.low %v124_v9, %v125_v10  ;;  %v65_v20 = vld [vmem:[%s2902_s1 + $0x54] sm:$0xf]  ;;  %v96_v21 = vld [vmem:[%s2903_s2 + $0x50] sm:$0xf]  ;;  %v126_v23 = vmul.bf16 %v94_v16, %v62_v12  ;;  %v127_v24 = vmul.bf16 %v95_v18, %v63_v13  ;;  %v2164_v25 = vld [vmem:[%s2901_s0 + $0x58] sm:$0xff]  }
  0x15   :  { %v97_v22 = vld [vmem:[%s2903_s2 + $0x54] sm:$0xf]  ;;  %v128_v26 = vmul.bf16 %v96_v21, %v64_v19  ;;  %v2169_v28 = vld [vmem:[%s2904_s6 + $0x38] sm:$0xff]   ;;  %v2165_v34 = vld [vmem:[%s2901_s0 + $0x60] sm:$0xff]  }
  0x16   :  { %1965 = vmatmul.mubr.msk.bf16.gmra.mxu1 %vm582_vm0, %v2158_v43  ;;  %v129_v27 = vmul.bf16 %v97_v22, %v65_v20  ;;  %v2170_v29 = vld [vmem:[%s2904_s6 + $0x30] sm:$0xff]   ;;  %v66_v30 = vld [vmem:[%s2902_s1 + $0x58] sm:$0xf]  ;;  %v67_v31 = vld [vmem:[%s2902_s1 + $0x5c] sm:$0xf]  ;;  %1988 = vmatprep.subr.bf16.mxu1 %v2169_v28  ;;  %v1717_v35 = vcombine.low %v126_v23, %v127_v24 }
  0x17   :  { %1968 = vmatprep.mubr.msk.bf16.mxu1 %vm582_vm0, %v2159_v46  ;;  %v98_v32 = vld [vmem:[%s2903_s2 + $0x58] sm:$0xf]  ;;  %v99_v33 = vld [vmem:[%s2903_s2 + $0x5c] sm:$0xf]  ;;  %v68_v36 = vld [vmem:[%s2902_s1 + $0x60] sm:$0xf]  ;;  %1989 = vmatpush3.bf16.msra.mxu1 %v2169_v28 }
  0x18   :  { %v69_v37 = vld [vmem:[%s2902_s1 + $0x64] sm:$0xf]  ;;  %v100_v38 = vld [vmem:[%s2903_s2 + $0x60] sm:$0xf]  ;;  %v1718_v39 = vcombine.low %v128_v26, %v129_v27  ;;  %1990 = vmatprep.subr.bf16.mxu1 %v2170_v29  ;;  %v2171_v40 = vld [vmem:[%s2904_s6 + $0x28] sm:$0xff]   ;;  %v130_v42 = vmul.bf16 %v98_v32, %v66_v30  ;;  %v131_v43 = vmul.bf16 %v99_v33, %v67_v31 }
  0x19   :  { %v101_v41 = vld [vmem:[%s2903_s2 + $0x64] sm:$0xf]  ;;  %v132_v44 = vmul.bf16 %v100_v38, %v68_v36  ;;  %v2167_v48 = vld [vmem:[%s2901_s0 + $0x70] sm:$0xff]   ;;  %v70_v50 = vld [vmem:[%s2902_s1 + $0x68] sm:$0xf] }
  0x1a   :  { %1927 = vmatmul.mubr.msk.bf16.gmra.mxu0 %vm286_vm1, %v1711_v47  ;;  %v133_v45 = vmul.bf16 %v101_v41, %v69_v37  ;;  %v2172_v46 = vld [vmem:[%s2904_s6 + $0x20] sm:$0xff]   ;;  %v2166_v47 = vld [vmem:[%s2901_s0 + $0x68] sm:$0xff]   ;;  %v1719_v49 = vcombine.low %v130_v42, %v131_v43  ;;  %v72_v55 = vld [vmem:[%s2902_s1 + $0x70] sm:$0xf] }
  0x1b   :  { %1930 = vmatprep.mubr.msk.bf16.mxu0 %vm286_vm1, %v1712_v51  ;;  %1991 = vmatpush3.bf16.msra.mxu1 %v2170_v29  ;;  %v71_v51 = vld [vmem:[%s2902_s1 + $0x6c] sm:$0xf]  ;;  %v102_v52 = vld [vmem:[%s2903_s2 + $0x68] sm:$0xf]  ;;  %v2173_v56 = vld [vmem:[%s2904_s6 + $0x18] sm:$0xff]  }
  0x1c   :  { %1992 = vmatprep.subr.bf16.mxu1 %v2171_v40  ;;  %v1720_v53 = vcombine.low %v132_v44, %v133_v45  ;;  %v103_v54 = vld [vmem:[%s2903_s2 + $0x6c] sm:$0xf]  ;;  %v73_v57 = vld [vmem:[%s2902_s1 + $0x74] sm:$0xf]  ;;  %v104_v58 = vld [vmem:[%s2903_s2 + $0x70] sm:$0xf] }
  0x1d   :  { %v136_v62 = vmul.bf16 %v104_v58, %v72_v55  ;;  %v2168_v1 = vld [vmem:[%s2901_s0 + $0x78] sm:$0xff]   ;;  %v2176_v12 = vld [vmem:[%s2904_s6] sm:$0xff]   ;;  %v2182_v18 = vld [vmem:[%s2905_s8 + $0x10] sm:$0xff]  }
  0x1e   :  { %1969 = vmatmul.mubr.msk.bf16.gmra.mxu1 %vm582_vm0, %v2160_v59  ;;  %v105_v59 = vld [vmem:[%s2903_s2 + $0x74] sm:$0xf]  ;;  %v74_v3 = vld [vmem:[%s2902_s1 + $0x78] sm:$0xf]  ;;  %v75_v5 = vld [vmem:[%s2902_s1 + $0x7c] sm:$0xf] }
  0x1f   :  { %1972 = vmatprep.mubr.msk.bf16.mxu1 %vm582_vm0, %v2161_v60  ;;  %1993 = vmatpush3.bf16.msra.mxu1 %v2171_v40  ;;  %v134_v60 = vmul.bf16 %v102_v52, %v70_v50  ;;  %v137_v63 = vmul.bf16 %v105_v59, %v73_v57  ;;  %v106_v6 = vld [vmem:[%s2903_s2 + $0x78] sm:$0xf]  ;;  %v107_v7 = vld [vmem:[%s2903_s2 + $0x7c] sm:$0xf]  ;;  %v2180_v16 = vld [vmem:[%s2905_s8 + $0x20] sm:$0xff]  }
  0x20   :  { %1994 = vmatprep.subr.bf16.mxu1 %v2172_v46  ;;  %v138_v8 = vmul.bf16 %v106_v6, %v74_v3  ;;  %v139_v9 = vmul.bf16 %v107_v7, %v75_v5  ;;  %v2177_v13 = vld [vmem:[%s2905_s8 + $0x38] sm:$0xff]   ;;  %v2183_v19 = vld [vmem:[%s2905_s8 + $0x8] sm:$0xff]   ;;  %v2593_v33 = vld [vmem:[%s2906_s5] ss:$0 sm:$0xff] }
  0x21   :  { %v1722_v4 = vcombine.low %v136_v62, %v137_v63  ;;  %2036 = vmatprep.subr.bf16.mxu0 %v2177_v13 }
  0x22   :  { %1931 = vmatmul.mubr.msk.bf16.gmra.mxu0 %vm286_vm1, %v1713_v61  ;;  %v135_v61 = vmul.bf16 %v103_v54, %v71_v51  ;;  %v1723_v10 = vcombine.low %v138_v8, %v139_v9 }
  0x23   :  { %1934 = vmatprep.mubr.msk.bf16.mxu0 %vm286_vm1, %v1714_v0  ;;  %1995 = vmatpush3.bf16.msra.mxu1 %v2172_v46  ;;  %v2174_v0 = vld [vmem:[%s2904_s6 + $0x10] sm:$0xff]  }
  0x24   :  { %1996 = vmatprep.subr.bf16.mxu1 %v2173_v56  ;;  %v1721_v2 = vcombine.low %v134_v60, %v135_v61  ;;  %2037 = vmatpush3.bf16.msra.mxu0 %v2177_v13 }
  0x26   :  { %1973 = vmatmul.mubr.msk.bf16.gmra.mxu1 %vm582_vm0, %v2162_v11  ;;  %v2175_v11 = vld [vmem:[%s2904_s6 + $0x8] sm:$0xff]  }
  0x27   :  { %1976 = vmatprep.mubr.msk.bf16.mxu1 %vm582_vm0, %v2163_v14  ;;  %1997 = vmatpush3.bf16.msra.mxu1 %v2173_v56  ;;  %v2178_v14 = vld [vmem:[%s2905_s8 + $0x30] sm:$0xff]  }
  0x28   :  { %1998 = vmatprep.subr.bf16.mxu1 %v2174_v0  ;;  %2038 = vmatprep.subr.bf16.mxu0 %v2178_v14 }
  0x29   :  { %2039 = vmatpush3.bf16.msra.mxu0 %v2178_v14 }
  0x2a   :  { %1935 = vmatmul.mubr.msk.bf16.gmra.mxu0 %vm286_vm1, %v1715_v15  ;;  %v2179_v15 = vld [vmem:[%s2905_s8 + $0x28] sm:$0xff]  }
  0x2b   :  { %1938 = vmatprep.mubr.msk.bf16.mxu0 %vm286_vm1, %v1716_v17  ;;  %1999 = vmatpush3.bf16.msra.mxu1 %v2174_v0  ;;  %v2181_v17 = vld [vmem:[%s2905_s8 + $0x18] sm:$0xff]  }
  0x2c   :  { %2000 = vmatprep.subr.bf16.mxu1 %v2175_v11  ;;  %2040 = vmatprep.subr.bf16.mxu0 %v2179_v15 }
  0x2d   :  { %2041 = vmatpush3.bf16.msra.mxu0 %v2179_v15 }
  0x2e   :  { %1977 = vmatmul.mubr.msk.bf16.gmra.mxu1 %vm582_vm0, %v2164_v25  ;;  %2042 = vmatprep.subr.bf16.mxu0 %v2180_v16 }
  0x2f   :  { %1980 = vmatprep.mubr.msk.bf16.mxu1 %vm582_vm0, %v2165_v34  ;;  %2001 = vmatpush3.bf16.msra.mxu1 %v2175_v11 }
  0x30   :  { %2002 = vmatprep.subr.bf16.mxu1 %v2176_v12 }
  0x31   :  { %2043 = vmatpush3.bf16.msra.mxu0 %v2180_v16 }
  0x32   :  { %1939 = vmatmul.mubr.msk.bf16.gmra.mxu0 %vm286_vm1, %v1717_v35  ;;  %2044 = vmatprep.subr.bf16.mxu0 %v2181_v17 }
  0x33   :  { %1942 = vmatprep.mubr.msk.bf16.mxu0 %vm286_vm1, %v1718_v39  ;;  %2003 = vmatpush3.bf16.msra.mxu1 %v2176_v12 }
  0x35   :  { %2045 = vmatpush3.bf16.msra.mxu0 %v2181_v17 }
  0x36   :  { %1981 = vmatmul.mubr.msk.bf16.gmra.mxu1 %vm582_vm0, %v2166_v47  ;;  %2046 = vmatprep.subr.bf16.mxu0 %v2182_v18 }
  0x37   :  { %1984 = vmatprep.mubr.msk.bf16.mxu1 %vm582_vm0, %v2167_v48 }
  0x39   :  { %2047 = vmatpush3.bf16.msra.mxu0 %v2182_v18 }
  0x3a   :  { %1943 = vmatmul.mubr.msk.bf16.gmra.mxu0 %vm286_vm1, %v1719_v49  ;;  %2048 = vmatprep.subr.bf16.mxu0 %v2183_v19 }
  0x3b   :  { %1946 = vmatprep.mubr.msk.bf16.mxu0 %vm286_vm1, %v1720_v53 }
  0x3d   :  { %2049 = vmatpush3.bf16.msra.mxu0 %v2183_v19 }
  0x3e   :  { %1985 = vmatmul.mubr.msk.bf16.gmra.mxu1 %vm582_vm0, %v2168_v1 }
  0x42   :  { %1947 = vmatmul.mubr.msk.bf16.gmra.mxu0 %vm286_vm1, %v1721_v2 }
  0x43   :  { %1950 = vmatprep.mubr.msk.bf16.mxu0 %vm286_vm1, %v1722_v4 }
  0x4a   :  { %1951 = vmatmul.mubr.msk.bf16.gmra.mxu0 %vm286_vm1, %v1723_v10 }
  0xc6   :  { %v1958_v20 = vpop.f32.mrf.mxu1 }
  0xc8   :  { %v665_v21 = vpop.f32.mrf.mxu1 }
  0xca   :  { %v1959_v22 = vpop.f32.mrf.mxu1 }
  0xcc   :  { %v668_v23 = vpop.f32.mrf.mxu1 }
  0xce   :  { %v1962_v24 = vpop.f32.mrf.mxu1 }
  0xd0   :  { %v681_v26 = vpop.f32.mrf.mxu1 }
  0xd2   :  { %v1924_v25 = vpop.f32.mrf.mxu0  ;;  %v1963_v28 = vpop.f32.mrf.mxu1 }
  0xd3   :  { %v674_v30 = vadd.f32 %v1958_v20, %v1924_v25 }
  0xd4   :  { %v369_v27 = vpop.f32.mrf.mxu0  ;;  %v684_v32 = vpop.f32.mrf.mxu1 }
  0xd5   :  { %v666_v29 = vadd.f32 %v665_v21, %v369_v27  ;;  %v801_v40 = vadd.f32 %v2593_v33, %v674_v30 }
  0xd6   :  { %v1925_v31 = vpop.f32.mrf.mxu0  ;;  %v1966_v36 = vpop.f32.mrf.mxu1 }
  0xd7   :  { %v677_v34 = vadd.f32 %v1959_v22, %v1925_v31  ;;  %v799_v37 = vadd.f32 %v2593_v33, %v666_v29  ;;  %v833_v50 = vmax.f32 %v801_v40, 0.0 }
  0xd8   :  { %v372_v35 = vpop.f32.mrf.mxu0  ;;  %v697_v42 = vpop.f32.mrf.mxu1 }
  0xd9   :  { %v802_v38 = vadd.f32 %v2593_v33, %v677_v34  ;;  %v669_v39 = vadd.f32 %v668_v23, %v372_v35  ;;  %v831_v47 = vmax.f32 %v799_v37, 0.0 }
  0xda   :  { %v1928_v41 = vpop.f32.mrf.mxu0  ;;  %v1967_v46 = vpop.f32.mrf.mxu1 }
  0xdb   :  { %v800_v43 = vadd.f32 %v2593_v33, %v669_v39  ;;  %v834_v44 = vmax.f32 %v802_v38, 0.0  ;;  %v690_v51 = vadd.f32 %v1962_v24, %v1928_v41 }
  0xdc   :  { %v385_v45 = vpop.f32.mrf.mxu0  ;;  %v700_v53 = vpop.f32.mrf.mxu1 }
  0xdd   :  { %v832_v48 = vmax.f32 %v800_v43, 0.0  ;;  %v682_v49 = vadd.f32 %v681_v26, %v385_v45  ;;  %v864_v56 = vpack.c.bf16 %v834_v44, %v833_v50  ;;  %v805_v62 = vadd.f32 %v2593_v33, %v690_v51 }
  0xde   :  { %v1929_v52 = vpop.f32.mrf.mxu0  ;;  %v1970_v58 = vpop.f32.mrf.mxu1 }
  0xdf   :  { %v693_v54 = vadd.f32 %v1963_v28, %v1929_v52  ;;  %v863_v55 = vpack.c.bf16 %v832_v48, %v831_v47  ;;  %v803_v59 = vadd.f32 %v2593_v33, %v682_v49  ;;  %v837_v8 = vmax.f32 %v805_v62, 0.0 }
  0xe0   :  { %v388_v57 = vpop.f32.mrf.mxu0  ;;  %v713_v0 = vpop.f32.mrf.mxu1 }
  0xe1   :  { %v806_v60 = vadd.f32 %v2593_v33, %v693_v54  ;;  %v685_v61 = vadd.f32 %v684_v32, %v388_v57  ;;  %2004 = vmatprep.mubr.bf16.mxu1 %v863_v55  ;;  %v835_v5 = vmax.f32 %v803_v59, 0.0 }
  0xe2   :  { %v1932_v63 = vpop.f32.mrf.mxu0  ;;  %2005 = vmatmul.mubr.bf16.vlgmr.msra.gmra.mxu1 %v864_v56  ;;  %v1971_v4 = vpop.f32.mrf.mxu1 }
  0xe3   :  { %v804_v1 = vadd.f32 %v2593_v33, %v685_v61  ;;  %v838_v2 = vmax.f32 %v806_v60, 0.0  ;;  %v706_v9 = vadd.f32 %v1966_v36, %v1932_v63 }
  0xe4   :  { %v401_v3 = vpop.f32.mrf.mxu0  ;;  %v716_v11 = vpop.f32.mrf.mxu1 }
  0xe5   :  { %v836_v6 = vmax.f32 %v804_v1, 0.0  ;;  %v698_v7 = vadd.f32 %v697_v42, %v401_v3  ;;  %v866_v15 = vpack.c.bf16 %v838_v2, %v837_v8  ;;  %v809_v20 = vadd.f32 %v2593_v33, %v706_v9 }
  0xe6   :  { %v1933_v10 = vpop.f32.mrf.mxu0  ;;  %v1974_v16 = vpop.f32.mrf.mxu1 }
  0xe7   :  { %v709_v12 = vadd.f32 %v1967_v46, %v1933_v10  ;;  %v865_v13 = vpack.c.bf16 %v836_v6, %v835_v5  ;;  %v807_v17 = vadd.f32 %v2593_v33, %v698_v7  ;;  %v841_v30 = vmax.f32 %v809_v20, 0.0 }
  0xe8   :  { %v404_v14 = vpop.f32.mrf.mxu0  ;;  %v729_v22 = vpop.f32.mrf.mxu1 }
  0xe9   :  { %v810_v18 = vadd.f32 %v2593_v33, %v709_v12  ;;  %v701_v19 = vadd.f32 %v700_v53, %v404_v14  ;;  %2008 = vmatprep.mubr.bf16.mxu1 %v865_v13  ;;  %v839_v27 = vmax.f32 %v807_v17, 0.0 }
  0xea   :  { %v1936_v21 = vpop.f32.mrf.mxu0  ;;  %2009 = vmatmul.mubr.bf16.gmra.mxu1 %v866_v15  ;;  %v1975_v26 = vpop.f32.mrf.mxu1 }
  0xeb   :  { %v808_v23 = vadd.f32 %v2593_v33, %v701_v19  ;;  %v842_v24 = vmax.f32 %v810_v18, 0.0  ;;  %v722_v31 = vadd.f32 %v1970_v58, %v1936_v21 }
  0xec   :  { %v417_v25 = vpop.f32.mrf.mxu0  ;;  %v732_v34 = vpop.f32.mrf.mxu1 }
  0xed   :  { %v840_v28 = vmax.f32 %v808_v23, 0.0  ;;  %v714_v29 = vadd.f32 %v713_v0, %v417_v25  ;;  %v868_v38 = vpack.c.bf16 %v842_v24, %v841_v30  ;;  %v813_v43 = vadd.f32 %v2593_v33, %v722_v31 }
  0xee   :  { %v1937_v32 = vpop.f32.mrf.mxu0  ;;  %v1978_v39 = vpop.f32.mrf.mxu1 }
  0xef   :  { %v725_v35 = vadd.f32 %v1971_v4, %v1937_v32  ;;  %v867_v36 = vpack.c.bf16 %v840_v28, %v839_v27  ;;  %v811_v40 = vadd.f32 %v2593_v33, %v714_v29  ;;  %v845_v53 = vmax.f32 %v813_v43, 0.0 }
  0xf0   :  { %v420_v37 = vpop.f32.mrf.mxu0  ;;  %v745_v45 = vpop.f32.mrf.mxu1 }
  0xf1   :  { %v814_v41 = vadd.f32 %v2593_v33, %v725_v35  ;;  %v717_v42 = vadd.f32 %v716_v11, %v420_v37  ;;  %2012 = vmatprep.mubr.bf16.mxu1 %v867_v36  ;;  %v843_v50 = vmax.f32 %v811_v40, 0.0 }
  0xf2   :  { %v1940_v44 = vpop.f32.mrf.mxu0  ;;  %2013 = vmatmul.mubr.bf16.gmra.mxu1 %v868_v38  ;;  %v1979_v49 = vpop.f32.mrf.mxu1 }
  0xf3   :  { %v812_v46 = vadd.f32 %v2593_v33, %v717_v42  ;;  %v846_v47 = vmax.f32 %v814_v41, 0.0  ;;  %v738_v54 = vadd.f32 %v1974_v16, %v1940_v44 }
  0xf4   :  { %v433_v48 = vpop.f32.mrf.mxu0  ;;  %v748_v56 = vpop.f32.mrf.mxu1 }
  0xf5   :  { %v844_v51 = vmax.f32 %v812_v46, 0.0  ;;  %v730_v52 = vadd.f32 %v729_v22, %v433_v48  ;;  %v870_v60 = vpack.c.bf16 %v846_v47, %v845_v53  ;;  %v817_v1 = vadd.f32 %v2593_v33, %v738_v54 }
  0xf6   :  { %v1941_v55 = vpop.f32.mrf.mxu0  ;;  %v1982_v61 = vpop.f32.mrf.mxu1 }
  0xf7   :  { %v741_v57 = vadd.f32 %v1975_v26, %v1941_v55  ;;  %v869_v58 = vpack.c.bf16 %v844_v51, %v843_v50  ;;  %v815_v62 = vadd.f32 %v2593_v33, %v730_v52  ;;  %v849_v11 = vmax.f32 %v817_v1, 0.0 }
  0xf8   :  { %v436_v59 = vpop.f32.mrf.mxu0  ;;  %v761_v3 = vpop.f32.mrf.mxu1 }
  0xf9   :  { %v818_v63 = vadd.f32 %v2593_v33, %v741_v57  ;;  %v733_v0 = vadd.f32 %v732_v34, %v436_v59  ;;  %2016 = vmatprep.mubr.bf16.mxu1 %v869_v58  ;;  %v847_v8 = vmax.f32 %v815_v62, 0.0 }
  0xfa   :  { %v1944_v2 = vpop.f32.mrf.mxu0  ;;  %2017 = vmatmul.mubr.bf16.gmra.mxu1 %v870_v60  ;;  %v1983_v7 = vpop.f32.mrf.mxu1 }
  0xfb   :  { %v816_v4 = vadd.f32 %v2593_v33, %v733_v0  ;;  %v850_v5 = vmax.f32 %v818_v63, 0.0  ;;  %v754_v12 = vadd.f32 %v1978_v39, %v1944_v2 }
  0xfc   :  { %v449_v6 = vpop.f32.mrf.mxu0  ;;  %v764_v17 = vpop.f32.mrf.mxu1 }
  0xfd   :  { %v848_v9 = vmax.f32 %v816_v4, 0.0  ;;  %v746_v10 = vadd.f32 %v745_v45, %v449_v6  ;;  %v872_v18 = vpack.c.bf16 %v850_v5, %v849_v11  ;;  %v821_v22 = vadd.f32 %v2593_v33, %v754_v12  ;;  %v2645_v11 = vld [vmem:[%s2907_s10 + $0x18] sm:$0xff]  }
  0xfe   :  { %v1945_v13 = vpop.f32.mrf.mxu0  ;;  %v1986_v27 = vpop.f32.mrf.mxu1 }
  0xff   :  { %v757_v14 = vadd.f32 %v1979_v49, %v1945_v13  ;;  %v871_v15 = vpack.c.bf16 %v848_v9, %v847_v8  ;;  %v819_v19 = vadd.f32 %v2593_v33, %v746_v10  ;;  %v853_v31 = vmax.f32 %v821_v22, 0.0  ;;  %v2185_v8 = vld [vmem:[%s2907_s10 + $0x38] sm:$0xff]   ;;  %v2187_v9 = vld [vmem:[%s2907_s10 + $0x28] sm:$0xff]   ;;  %v2188_v10 = vld [vmem:[%s2907_s10 + $0x20] sm:$0xff]  }
 0x100   :  { %v452_v16 = vpop.f32.mrf.mxu0  ;;  %v777_v37 = vpop.f32.mrf.mxu1  ;;  %2132 = vmatprep.subr.bf16.mxu1 %v2185_v8 }
 0x101   :  { %v822_v20 = vadd.f32 %v2593_v33, %v757_v14  ;;  %v749_v21 = vadd.f32 %v748_v56, %v452_v16  ;;  %2020 = vmatprep.mubr.bf16.mxu1 %v871_v15  ;;  %v851_v28 = vmax.f32 %v819_v19, 0.0  ;;  %2140 = vmatpush3.bf16.msra.mxu1 %v2185_v8  ;;  %v2652_v14 = vld [vmem:[%s2908_s7] ss:$0 sm:$0xff] }
 0x102   :  { %v1948_v23 = vpop.f32.mrf.mxu0  ;;  %2021 = vmatmul.mubr.bf16.gmra.mxu1 %v872_v18  ;;  %v1987_v47 = vpop.f32.mrf.mxu1 }
 0x103   :  { %v820_v24 = vadd.f32 %v2593_v33, %v749_v21  ;;  %v854_v25 = vmax.f32 %v822_v20, 0.0  ;;  %v770_v32 = vadd.f32 %v1982_v61, %v1948_v23 }
 0x104   :  { %v465_v26 = vpop.f32.mrf.mxu0  ;;  %v780_v57 = vpop.f32.mrf.mxu1 }
 0x105   :  { %v852_v29 = vmax.f32 %v820_v24, 0.0  ;;  %v762_v30 = vadd.f32 %v761_v3, %v465_v26  ;;  %v874_v39 = vpack.c.bf16 %v854_v25, %v853_v31  ;;  %v825_v43 = vadd.f32 %v2593_v33, %v770_v32 }
 0x106   :  { %v1949_v34 = vpop.f32.mrf.mxu0 }
 0x107   :  { %v773_v35 = vadd.f32 %v1983_v7, %v1949_v34  ;;  %v873_v36 = vpack.c.bf16 %v852_v29, %v851_v28  ;;  %v823_v40 = vadd.f32 %v2593_v33, %v762_v30  ;;  %v857_v52 = vmax.f32 %v825_v43, 0.0  ;;  %v2184_v7 = vld [vmem:[%s2905_s8] sm:$0xff]  }
 0x108   :  { %v468_v38 = vpop.f32.mrf.mxu0  ;;  %2050 = vmatprep.subr.bf16.mxu0 %v2184_v7 }
 0x109   :  { %v826_v41 = vadd.f32 %v2593_v33, %v773_v35  ;;  %v765_v42 = vadd.f32 %v764_v17, %v468_v38  ;;  %2024 = vmatprep.mubr.bf16.mxu1 %v873_v36  ;;  %v855_v49 = vmax.f32 %v823_v40, 0.0  ;;  %2051 = vmatpush3.bf16.msra.mxu0 %v2184_v7 }
 0x10a   :  { %v1952_v44 = vpop.f32.mrf.mxu0  ;;  %2025 = vmatmul.mubr.bf16.gmra.mxu1 %v874_v39  ;;  %2084 = vmatprep.subr.bf16.mxu0 %v2185_v8 }
 0x10b   :  { %v824_v45 = vadd.f32 %v2593_v33, %v765_v42  ;;  %v858_v46 = vmax.f32 %v826_v41, 0.0  ;;  %v786_v53 = vadd.f32 %v1986_v27, %v1952_v44 }
 0x10c   :  { %v481_v48 = vpop.f32.mrf.mxu0 }
 0x10d   :  { %v856_v50 = vmax.f32 %v824_v45, 0.0  ;;  %v778_v51 = vadd.f32 %v777_v37, %v481_v48  ;;  %v876_v59 = vpack.c.bf16 %v858_v46, %v857_v52  ;;  %v829_v63 = vadd.f32 %v2593_v33, %v786_v53 }
 0x10e   :  { %v1953_v54 = vpop.f32.mrf.mxu0 }
 0x10f   :  { %v789_v55 = vadd.f32 %v1987_v47, %v1953_v54  ;;  %v875_v56 = vpack.c.bf16 %v856_v50, %v855_v49  ;;  %v827_v60 = vadd.f32 %v2593_v33, %v778_v51  ;;  %v861_v4 = vmax.f32 %v829_v63, 0.0 }
 0x110   :  { %v484_v58 = vpop.f32.mrf.mxu0 }
 0x111   :  { %v830_v61 = vadd.f32 %v2593_v33, %v789_v55  ;;  %v781_v62 = vadd.f32 %v780_v57, %v484_v58  ;;  %2028 = vmatprep.mubr.bf16.mxu1 %v875_v56  ;;  %v859_v2 = vmax.f32 %v827_v60, 0.0 }
 0x112   :  { %2029 = vmatmul.mubr.bf16.gmra.mxu1 %v876_v59 }
 0x113   :  { %v828_v0 = vadd.f32 %v2593_v33, %v781_v62  ;;  %v862_v1 = vmax.f32 %v830_v61, 0.0  ;;  %v2186_v33 = vld [vmem:[%s2907_s10 + $0x30] sm:$0xff]  }
 0x114   :  { %2133 = vmatprep.subr.bf16.mxu1 %v2186_v33 }
 0x115   :  { %v860_v3 = vmax.f32 %v828_v0, 0.0  ;;  %v878_v6 = vpack.c.bf16 %v862_v1, %v861_v4  ;;  %2141 = vmatpush3.bf16.msra.mxu1 %v2186_v33 }
 0x116   :  { %2134 = vmatprep.subr.bf16.mxu1 %v2187_v9 }
 0x117   :  { %v877_v5 = vpack.c.bf16 %v860_v3, %v859_v2 }
 0x119   :  { %2032 = vmatprep.mubr.bf16.mxu1 %v877_v5  ;;  %2142 = vmatpush3.bf16.msra.mxu1 %v2187_v9 }
 0x11a   :  { %2033 = vmatmul.mubr.bf16.gmra.mxu1 %v878_v6  ;;  %2135 = vmatprep.subr.bf16.mxu1 %v2188_v10 }
 0x11d   :  { %2143 = vmatpush3.bf16.msra.mxu1 %v2188_v10 }
 0x11e   :  { %2136 = vmatprep.subr.bf16.mxu1 %v2645_v11 }
 0x121   :  { %2144 = vmatpush3.bf16.msra.mxu1 %v2645_v11 }
 0x1a2   :  { %v2006_v12 = vpop.f32.mrf.mxu1 }
 0x1a3   :  { %v993_v18 = vadd.f32 %v2006_v12, %v2652_v14 }
 0x1a4   :  { %v984_v13 = vpop.f32.mrf.mxu1 }
 0x1a5   :  { %v985_v16 = vadd.f32 %v2652_v14, %v984_v13  ;;  %v1113_v25 = vmax.f32 %v993_v18, 0.0 }
 0x1a6   :  { %v2007_v15 = vpop.f32.mrf.mxu1 }
 0x1a7   :  { %v996_v17 = vadd.f32 %v2007_v15, %v2652_v14  ;;  %v1111_v23 = vmax.f32 %v985_v16, 0.0 }
 0x1a8   :  { %v987_v19 = vpop.f32.mrf.mxu1 }
 0x1a9   :  { %v988_v20 = vadd.f32 %v2652_v14, %v987_v19  ;;  %v1114_v21 = vmax.f32 %v996_v17, 0.0 }
 0x1aa   :  { %v2010_v22 = vpop.f32.mrf.mxu1 }
 0x1ab   :  { %v1112_v24 = vmax.f32 %v988_v20, 0.0  ;;  %v1144_v28 = vpack.c.bf16 %v1114_v21, %v1113_v25  ;;  %v1009_v32 = vadd.f32 %v2010_v22, %v2652_v14 }
 0x1ac   :  { %v1000_v26 = vpop.f32.mrf.mxu1 }
 0x1ad   :  { %v1143_v27 = vpack.c.bf16 %v1112_v24, %v1111_v23  ;;  %v1001_v30 = vadd.f32 %v2652_v14, %v1000_v26  ;;  %v1117_v40 = vmax.f32 %v1009_v32, 0.0 }
 0x1ae   :  { %v2011_v29 = vpop.f32.mrf.mxu1 }
 0x1af   :  { %v1012_v31 = vadd.f32 %v2011_v29, %v2652_v14  ;;  %2052 = vmatprep.mubr.bf16.mxu0 %v1143_v27  ;;  %v1115_v38 = vmax.f32 %v1001_v30, 0.0 }
 0x1b0   :  { %v1003_v34 = vpop.f32.mrf.mxu1  ;;  %2053 = vmatmul.mubr.bf16.vlgmr.msra.gmra.mxu0 %v1144_v28 }
 0x1b1   :  { %v1004_v35 = vadd.f32 %v2652_v14, %v1003_v34  ;;  %2085 = vmatpush3.bf16.msra.mxu0 %v2185_v8  ;;  %v1118_v36 = vmax.f32 %v1012_v31, 0.0 }
 0x1b2   :  { %v2014_v37 = vpop.f32.mrf.mxu1  ;;  %2086 = vmatprep.subr.bf16.mxu0 %v2186_v33 }
 0x1b3   :  { %v1116_v39 = vmax.f32 %v1004_v35, 0.0  ;;  %v1146_v43 = vpack.c.bf16 %v1118_v36, %v1117_v40  ;;  %v1025_v47 = vadd.f32 %v2014_v37, %v2652_v14 }
 0x1b4   :  { %v1016_v41 = vpop.f32.mrf.mxu1 }
 0x1b5   :  { %v1145_v42 = vpack.c.bf16 %v1116_v39, %v1115_v38  ;;  %2087 = vmatpush3.bf16.msra.mxu0 %v2186_v33  ;;  %v1017_v45 = vadd.f32 %v2652_v14, %v1016_v41  ;;  %v1121_v54 = vmax.f32 %v1025_v47, 0.0 }
 0x1b6   :  { %v2015_v44 = vpop.f32.mrf.mxu1  ;;  %2088 = vmatprep.subr.bf16.mxu0 %v2187_v9 }
 0x1b7   :  { %v1028_v46 = vadd.f32 %v2015_v44, %v2652_v14  ;;  %2056 = vmatprep.mubr.bf16.mxu0 %v1145_v42  ;;  %v1119_v52 = vmax.f32 %v1017_v45, 0.0 }
 0x1b8   :  { %v1019_v48 = vpop.f32.mrf.mxu1  ;;  %2057 = vmatmul.mubr.bf16.gmra.mxu0 %v1146_v43 }
 0x1b9   :  { %v1020_v49 = vadd.f32 %v2652_v14, %v1019_v48  ;;  %2089 = vmatpush3.bf16.msra.mxu0 %v2187_v9  ;;  %v1122_v50 = vmax.f32 %v1028_v46, 0.0 }
 0x1ba   :  { %v2018_v51 = vpop.f32.mrf.mxu1  ;;  %2090 = vmatprep.subr.bf16.mxu0 %v2188_v10 }
 0x1bb   :  { %v1120_v53 = vmax.f32 %v1020_v49, 0.0  ;;  %v1148_v57 = vpack.c.bf16 %v1122_v50, %v1121_v54  ;;  %v1041_v61 = vadd.f32 %v2018_v51, %v2652_v14 }
 0x1bc   :  { %v1032_v55 = vpop.f32.mrf.mxu1 }
 0x1bd   :  { %v1147_v56 = vpack.c.bf16 %v1120_v53, %v1119_v52  ;;  %2091 = vmatpush3.bf16.msra.mxu0 %v2188_v10  ;;  %v1033_v59 = vadd.f32 %v2652_v14, %v1032_v55  ;;  %v1125_v4 = vmax.f32 %v1041_v61, 0.0 }
 0x1be   :  { %v2019_v58 = vpop.f32.mrf.mxu1  ;;  %2092 = vmatprep.subr.bf16.mxu0 %v2645_v11 }
 0x1bf   :  { %v1044_v60 = vadd.f32 %v2019_v58, %v2652_v14  ;;  %2060 = vmatprep.mubr.bf16.mxu0 %v1147_v56  ;;  %v1123_v2 = vmax.f32 %v1033_v59, 0.0 }
 0x1c0   :  { %v1035_v62 = vpop.f32.mrf.mxu1  ;;  %2061 = vmatmul.mubr.bf16.gmra.mxu0 %v1148_v57 }
 0x1c1   :  { %v1036_v63 = vadd.f32 %v2652_v14, %v1035_v62  ;;  %2093 = vmatpush3.bf16.msra.mxu0 %v2645_v11  ;;  %v1126_v0 = vmax.f32 %v1044_v60, 0.0 }
 0x1c2   :  { %v2022_v1 = vpop.f32.mrf.mxu1 }
 0x1c3   :  { %v1124_v3 = vmax.f32 %v1036_v63, 0.0  ;;  %v1150_v7 = vpack.c.bf16 %v1126_v0, %v1125_v4  ;;  %v1057_v10 = vadd.f32 %v2022_v1, %v2652_v14  ;;  %v2190_v63 = vld [vmem:[%s2907_s10 + $0x10] sm:$0xff]   ;;  %v2192_v0 = vld [vmem:[%s2907_s10] sm:$0xff]   ;;  %v17_v1 = vstv %s2909_s11 }
 0x1c4   :  { %v1048_v5 = vpop.f32.mrf.mxu1  ;;  %2094 = vmatprep.subr.bf16.mxu0 %v2190_v63  ;;  %2137 = vmatprep.subr.bf16.mxu1 %v2190_v63  ;;  %18 = vst [vmem:[#allocation2] sm:$0x1] %v17_v1  ;;  %v2703_v4 = vld [vmem:[%s2910_s9] ss:$0 sm:$0xff] }
 0x1c5   :  { %v1149_v6 = vpack.c.bf16 %v1124_v3, %v1123_v2  ;;  %v1049_v33 = vadd.f32 %v2652_v14, %v1048_v5  ;;  %v1129_v18 = vmax.f32 %v1057_v10, 0.0  ;;  %2095 = vmatpush3.bf16.msra.mxu0 %v2190_v63  ;;  %2145 = vmatpush3.bf16.msra.mxu1 %v2190_v63 }
 0x1c6   :  { %v2023_v8 = vpop.f32.mrf.mxu1 }
 0x1c7   :  { %v1060_v9 = vadd.f32 %v2023_v8, %v2652_v14  ;;  %2064 = vmatprep.mubr.bf16.mxu0 %v1149_v6  ;;  %v1127_v16 = vmax.f32 %v1049_v33, 0.0 }
 0x1c8   :  { %v1051_v12 = vpop.f32.mrf.mxu1  ;;  %2065 = vmatmul.mubr.bf16.gmra.mxu0 %v1150_v7 }
 0x1c9   :  { %v1052_v11 = vadd.f32 %v2652_v14, %v1051_v12  ;;  %v1130_v13 = vmax.f32 %v1060_v9, 0.0 }
 0x1ca   :  { %v2026_v15 = vpop.f32.mrf.mxu1 }
 0x1cb   :  { %v1128_v17 = vmax.f32 %v1052_v11, 0.0  ;;  %v1152_v21 = vpack.c.bf16 %v1130_v13, %v1129_v18  ;;  %v1073_v25 = vadd.f32 %v2026_v15, %v2652_v14 }
 0x1cc   :  { %v1064_v19 = vpop.f32.mrf.mxu1 }
 0x1cd   :  { %v1151_v20 = vpack.c.bf16 %v1128_v17, %v1127_v16  ;;  %v1065_v23 = vadd.f32 %v2652_v14, %v1064_v19  ;;  %v1133_v32 = vmax.f32 %v1073_v25, 0.0 }
 0x1ce   :  { %v2027_v22 = vpop.f32.mrf.mxu1 }
 0x1cf   :  { %v1076_v24 = vadd.f32 %v2027_v22, %v2652_v14  ;;  %2068 = vmatprep.mubr.bf16.mxu0 %v1151_v20  ;;  %v1131_v30 = vmax.f32 %v1065_v23, 0.0 }
 0x1d0   :  { %v1067_v26 = vpop.f32.mrf.mxu1  ;;  %2069 = vmatmul.mubr.bf16.gmra.mxu0 %v1152_v21 }
 0x1d1   :  { %v1068_v27 = vadd.f32 %v2652_v14, %v1067_v26  ;;  %v1134_v28 = vmax.f32 %v1076_v24, 0.0 }
 0x1d2   :  { %v2030_v29 = vpop.f32.mrf.mxu1 }
 0x1d3   :  { %v1132_v31 = vmax.f32 %v1068_v27, 0.0  ;;  %v1154_v36 = vpack.c.bf16 %v1134_v28, %v1133_v32  ;;  %v1089_v40 = vadd.f32 %v2030_v29, %v2652_v14 }
 0x1d4   :  { %v1080_v34 = vpop.f32.mrf.mxu1 }
 0x1d5   :  { %v1153_v35 = vpack.c.bf16 %v1132_v31, %v1131_v30  ;;  %v1081_v38 = vadd.f32 %v2652_v14, %v1080_v34  ;;  %v1137_v47 = vmax.f32 %v1089_v40, 0.0 }
 0x1d6   :  { %v2031_v37 = vpop.f32.mrf.mxu1 }
 0x1d7   :  { %v1092_v39 = vadd.f32 %v2031_v37, %v2652_v14  ;;  %2072 = vmatprep.mubr.bf16.mxu0 %v1153_v35  ;;  %v1135_v45 = vmax.f32 %v1081_v38, 0.0 }
 0x1d8   :  { %v1083_v41 = vpop.f32.mrf.mxu1  ;;  %2073 = vmatmul.mubr.bf16.gmra.mxu0 %v1154_v36 }
 0x1d9   :  { %v1084_v42 = vadd.f32 %v2652_v14, %v1083_v41  ;;  %v1138_v43 = vmax.f32 %v1092_v39, 0.0 }
 0x1da   :  { %v2034_v44 = vpop.f32.mrf.mxu1 }
 0x1db   :  { %v1136_v46 = vmax.f32 %v1084_v42, 0.0  ;;  %v1156_v50 = vpack.c.bf16 %v1138_v43, %v1137_v47  ;;  %v1105_v54 = vadd.f32 %v2034_v44, %v2652_v14 }
 0x1dc   :  { %v1096_v48 = vpop.f32.mrf.mxu1 }
 0x1dd   :  { %v1155_v49 = vpack.c.bf16 %v1136_v46, %v1135_v45  ;;  %v1097_v52 = vadd.f32 %v2652_v14, %v1096_v48  ;;  %v1141_v60 = vmax.f32 %v1105_v54, 0.0 }
 0x1de   :  { %v2035_v51 = vpop.f32.mrf.mxu1 }
 0x1df   :  { %v1108_v53 = vadd.f32 %v2035_v51, %v2652_v14  ;;  %2076 = vmatprep.mubr.bf16.mxu0 %v1155_v49  ;;  %v1139_v58 = vmax.f32 %v1097_v52, 0.0 }
 0x1e0   :  { %v1099_v55 = vpop.f32.mrf.mxu1  ;;  %2077 = vmatmul.mubr.bf16.gmra.mxu0 %v1156_v50 }
 0x1e1   :  { %v1100_v56 = vadd.f32 %v2652_v14, %v1099_v55  ;;  %v1142_v57 = vmax.f32 %v1108_v53, 0.0  ;;  %v2191_v14 = vld [vmem:[%s2907_s10 + $0x8] sm:$0xff]  }
 0x1e2   :  { %2096 = vmatprep.subr.bf16.mxu0 %v2191_v14  ;;  %2138 = vmatprep.subr.bf16.mxu1 %v2191_v14 }
 0x1e3   :  { %v1140_v59 = vmax.f32 %v1100_v56, 0.0  ;;  %v1158_v62 = vpack.c.bf16 %v1142_v57, %v1141_v60  ;;  %2097 = vmatpush3.bf16.msra.mxu0 %v2191_v14  ;;  %2146 = vmatpush3.bf16.msra.mxu1 %v2191_v14 }
 0x1e4   :  { %2098 = vmatprep.subr.bf16.mxu0 %v2192_v0  ;;  %2139 = vmatprep.subr.bf16.mxu1 %v2192_v0 }
 0x1e5   :  { %v1157_v61 = vpack.c.bf16 %v1140_v59, %v1139_v58 }
 0x1e7   :  { %2080 = vmatprep.mubr.bf16.mxu0 %v1157_v61  ;;  %2099 = vmatpush3.bf16.msra.mxu0 %v2192_v0 }
 0x1e8   :  { %2081 = vmatmul.mubr.bf16.gmra.mxu0 %v1158_v62  ;;  %2147 = vmatpush3.bf16.msra.mxu1 %v2192_v0 }
 0x270   :  { %v2054_v2 = vpop.f32.mrf.mxu0 }
 0x271   :  { %v1273_v8 = vadd.f32 %v2054_v2, %v2703_v4 }
 0x272   :  { %v1264_v3 = vpop.f32.mrf.mxu0 }
 0x273   :  { %v1265_v6 = vadd.f32 %v2703_v4, %v1264_v3  ;;  %v1393_v15 = vmax.f32 %v1273_v8, 0.0 }
 0x274   :  { %v2055_v5 = vpop.f32.mrf.mxu0 }
 0x275   :  { %v1276_v7 = vadd.f32 %v2055_v5, %v2703_v4  ;;  %v1391_v11 = vmax.f32 %v1265_v6, 0.0 }
 0x276   :  { %v1267_v33 = vpop.f32.mrf.mxu0 }
 0x277   :  { %v1268_v9 = vadd.f32 %v2703_v4, %v1267_v33  ;;  %v1394_v10 = vmax.f32 %v1276_v7, 0.0 }
 0x278   :  { %v2058_v12 = vpop.f32.mrf.mxu0 }
 0x279   :  { %v1392_v13 = vmax.f32 %v1268_v9, 0.0  ;;  %v1424_v18 = vpack.c.bf16 %v1394_v10, %v1393_v15  ;;  %v1289_v22 = vadd.f32 %v2058_v12, %v2703_v4 }
 0x27a   :  { %v1280_v16 = vpop.f32.mrf.mxu0 }
 0x27b   :  { %v1423_v17 = vpack.c.bf16 %v1392_v13, %v1391_v11  ;;  %v1281_v20 = vadd.f32 %v2703_v4, %v1280_v16  ;;  %v1397_v29 = vmax.f32 %v1289_v22, 0.0 }
 0x27c   :  { %v2059_v19 = vpop.f32.mrf.mxu0 }
 0x27d   :  { %v1292_v21 = vadd.f32 %v2059_v19, %v2703_v4  ;;  %2100 = vmatprep.mubr.bf16.mxu0 %v1423_v17  ;;  %v1395_v27 = vmax.f32 %v1281_v20, 0.0 }
 0x27e   :  { %v1283_v23 = vpop.f32.mrf.mxu0  ;;  %2101 = vmatmul.mubr.bf16.vlgmr.msra.gmra.mxu0 %v1424_v18 }
 0x27f   :  { %v1284_v24 = vadd.f32 %v2703_v4, %v1283_v23  ;;  %v1398_v25 = vmax.f32 %v1292_v21, 0.0 }
 0x280   :  { %v2062_v26 = vpop.f32.mrf.mxu0 }
 0x281   :  { %v1396_v28 = vmax.f32 %v1284_v24, 0.0  ;;  %v1426_v32 = vpack.c.bf16 %v1398_v25, %v1397_v29  ;;  %v1305_v37 = vadd.f32 %v2062_v26, %v2703_v4 }
 0x282   :  { %v1296_v30 = vpop.f32.mrf.mxu0 }
 0x283   :  { %v1425_v31 = vpack.c.bf16 %v1396_v28, %v1395_v27  ;;  %v1297_v35 = vadd.f32 %v2703_v4, %v1296_v30  ;;  %v1401_v44 = vmax.f32 %v1305_v37, 0.0 }
 0x284   :  { %v2063_v34 = vpop.f32.mrf.mxu0 }
 0x285   :  { %v1308_v36 = vadd.f32 %v2063_v34, %v2703_v4  ;;  %2104 = vmatprep.mubr.bf16.mxu0 %v1425_v31  ;;  %v1399_v42 = vmax.f32 %v1297_v35, 0.0 }
 0x286   :  { %v1299_v38 = vpop.f32.mrf.mxu0  ;;  %2105 = vmatmul.mubr.bf16.gmra.mxu0 %v1426_v32 }
 0x287   :  { %v1300_v39 = vadd.f32 %v2703_v4, %v1299_v38  ;;  %v1402_v40 = vmax.f32 %v1308_v36, 0.0 }
 0x288   :  { %v2066_v41 = vpop.f32.mrf.mxu0 }
 0x289   :  { %v1400_v43 = vmax.f32 %v1300_v39, 0.0  ;;  %v1428_v47 = vpack.c.bf16 %v1402_v40, %v1401_v44  ;;  %v1321_v51 = vadd.f32 %v2066_v41, %v2703_v4 }
 0x28a   :  { %v1312_v45 = vpop.f32.mrf.mxu0 }
 0x28b   :  { %v1427_v46 = vpack.c.bf16 %v1400_v43, %v1399_v42  ;;  %v1313_v49 = vadd.f32 %v2703_v4, %v1312_v45  ;;  %v1405_v58 = vmax.f32 %v1321_v51, 0.0 }
 0x28c   :  { %v2067_v48 = vpop.f32.mrf.mxu0 }
 0x28d   :  { %v1324_v50 = vadd.f32 %v2067_v48, %v2703_v4  ;;  %2108 = vmatprep.mubr.bf16.mxu0 %v1427_v46  ;;  %v1403_v56 = vmax.f32 %v1313_v49, 0.0 }
 0x28e   :  { %v1315_v52 = vpop.f32.mrf.mxu0  ;;  %2109 = vmatmul.mubr.bf16.gmra.mxu0 %v1428_v47 }
 0x28f   :  { %v1316_v53 = vadd.f32 %v2703_v4, %v1315_v52  ;;  %v1406_v54 = vmax.f32 %v1324_v50, 0.0 }
 0x290   :  { %v2070_v55 = vpop.f32.mrf.mxu0 }
 0x291   :  { %v1404_v57 = vmax.f32 %v1316_v53, 0.0  ;;  %v1430_v61 = vpack.c.bf16 %v1406_v54, %v1405_v58  ;;  %v1337_v0 = vadd.f32 %v2070_v55, %v2703_v4  ;;  %v2737_v53 = vld [vmem:[#allocation2] ss:$0 sm:$0xff] }
 0x292   :  { %v1328_v59 = vpop.f32.mrf.mxu0 }
 0x293   :  { %v1429_v60 = vpack.c.bf16 %v1404_v57, %v1403_v56  ;;  %v1329_v63 = vadd.f32 %v2703_v4, %v1328_v59  ;;  %v1409_v8 = vmax.f32 %v1337_v0, 0.0 }
 0x294   :  { %v2071_v62 = vpop.f32.mrf.mxu0 }
 0x295   :  { %v1340_v14 = vadd.f32 %v2071_v62, %v2703_v4  ;;  %2112 = vmatprep.mubr.bf16.mxu1 %v1429_v60  ;;  %v1407_v6 = vmax.f32 %v1329_v63, 0.0 }
 0x296   :  { %v1331_v1 = vpop.f32.mrf.mxu0  ;;  %2113 = vmatmul.mubr.bf16.vlgmr.msra.gmra.mxu1 %v1430_v61 }
 0x297   :  { %v1332_v2 = vadd.f32 %v2703_v4, %v1331_v1  ;;  %v1410_v3 = vmax.f32 %v1340_v14, 0.0 }
 0x298   :  { %v2074_v5 = vpop.f32.mrf.mxu0 }
 0x299   :  { %v1408_v7 = vmax.f32 %v1332_v2, 0.0  ;;  %v1432_v10 = vpack.c.bf16 %v1410_v3, %v1409_v8  ;;  %v1353_v15 = vadd.f32 %v2074_v5, %v2703_v4 }
 0x29a   :  { %v1344_v33 = vpop.f32.mrf.mxu0 }
 0x29b   :  { %v1431_v9 = vpack.c.bf16 %v1408_v7, %v1407_v6  ;;  %v1345_v11 = vadd.f32 %v2703_v4, %v1344_v33  ;;  %v1413_v22 = vmax.f32 %v1353_v15, 0.0 }
 0x29c   :  { %v2075_v12 = vpop.f32.mrf.mxu0 }
 0x29d   :  { %v1356_v13 = vadd.f32 %v2075_v12, %v2703_v4  ;;  %2116 = vmatprep.mubr.bf16.mxu1 %v1431_v9  ;;  %v1411_v20 = vmax.f32 %v1345_v11, 0.0 }
 0x29e   :  { %v1347_v16 = vpop.f32.mrf.mxu0  ;;  %2117 = vmatmul.mubr.bf16.gmra.mxu1 %v1432_v10 }
 0x29f   :  { %v1348_v17 = vadd.f32 %v2703_v4, %v1347_v16  ;;  %v1414_v18 = vmax.f32 %v1356_v13, 0.0 }
 0x2a0   :  { %v2078_v19 = vpop.f32.mrf.mxu0 }
 0x2a1   :  { %v1412_v21 = vmax.f32 %v1348_v17, 0.0  ;;  %v1434_v25 = vpack.c.bf16 %v1414_v18, %v1413_v22  ;;  %v1369_v29 = vadd.f32 %v2078_v19, %v2703_v4 }
 0x2a2   :  { %v1360_v23 = vpop.f32.mrf.mxu0 }
 0x2a3   :  { %v1433_v24 = vpack.c.bf16 %v1412_v21, %v1411_v20  ;;  %v1361_v27 = vadd.f32 %v2703_v4, %v1360_v23  ;;  %v1417_v37 = vmax.f32 %v1369_v29, 0.0 }
 0x2a4   :  { %v2079_v26 = vpop.f32.mrf.mxu0 }
 0x2a5   :  { %v1372_v28 = vadd.f32 %v2079_v26, %v2703_v4  ;;  %2120 = vmatprep.mubr.bf16.mxu1 %v1433_v24  ;;  %v1415_v35 = vmax.f32 %v1361_v27, 0.0 }
 0x2a6   :  { %v1363_v30 = vpop.f32.mrf.mxu0  ;;  %2121 = vmatmul.mubr.bf16.gmra.mxu1 %v1434_v25 }
 0x2a7   :  { %v1364_v31 = vadd.f32 %v2703_v4, %v1363_v30  ;;  %v1418_v32 = vmax.f32 %v1372_v28, 0.0 }
 0x2a8   :  { %v2082_v34 = vpop.f32.mrf.mxu0 }
 0x2a9   :  { %v1416_v36 = vmax.f32 %v1364_v31, 0.0  ;;  %v1436_v40 = vpack.c.bf16 %v1418_v32, %v1417_v37  ;;  %v1385_v44 = vadd.f32 %v2082_v34, %v2703_v4 }
 0x2aa   :  { %v1376_v38 = vpop.f32.mrf.mxu0 }
 0x2ab   :  { %v1435_v39 = vpack.c.bf16 %v1416_v36, %v1415_v35  ;;  %v1377_v42 = vadd.f32 %v2703_v4, %v1376_v38  ;;  %v1421_v50 = vmax.f32 %v1385_v44, 0.0 }
 0x2ac   :  { %v2083_v41 = vpop.f32.mrf.mxu0 }
 0x2ad   :  { %v1388_v43 = vadd.f32 %v2083_v41, %v2703_v4  ;;  %2124 = vmatprep.mubr.bf16.mxu1 %v1435_v39  ;;  %v1419_v48 = vmax.f32 %v1377_v42, 0.0 }
 0x2ae   :  { %v1379_v45 = vpop.f32.mrf.mxu0  ;;  %2125 = vmatmul.mubr.bf16.gmra.mxu1 %v1436_v40 }
 0x2af   :  { %v1380_v46 = vadd.f32 %v2703_v4, %v1379_v45  ;;  %v1422_v47 = vmax.f32 %v1388_v43, 0.0 }
 0x2b1   :  { %v1420_v49 = vmax.f32 %v1380_v46, 0.0  ;;  %v1438_v52 = vpack.c.bf16 %v1422_v47, %v1421_v50 }
 0x2b3   :  { %v1437_v51 = vpack.c.bf16 %v1420_v49, %v1419_v48 }
 0x2b5   :  { %2128 = vmatprep.mubr.bf16.mxu1 %v1437_v51 }
 0x2b6   :  { %2129 = vmatmul.mubr.bf16.gmra.mxu1 %v1438_v52 }
 0x33e   :  { %v2102_v54 = vpop.f32.mrf.mxu0 }
 0x33f   :  { %v1553_v55 = vadd.f32 %v2102_v54, %v2737_v53 }
 0x340   :  { %v1544_v56 = vpop.f32.mrf.mxu0 }
 0x341   :  { %1674 = vst.msk [vmem:[%s2911_s12 + $0x10] sm:$0xff] %vm1671_vm2, %v1553_v55  ;;  %v1545_v4 = vadd.f32 %v2737_v53, %v1544_v56 }
 0x342   :  { %v2103_v57 = vpop.f32.mrf.mxu0 }
 0x343   :  { %1672 = vst.msk [vmem:[%s2911_s12] sm:$0xff] %vm1671_vm2, %v1545_v4  ;;  %v1556_v58 = vadd.f32 %v2103_v57, %v2737_v53 }
 0x344   :  { %v1547_v59 = vpop.f32.mrf.mxu0 }
 0x345   :  { %1675 = vst.msk [vmem:[%s2911_s12 + $0x18] sm:$0xff] %vm1671_vm2, %v1556_v58  ;;  %v1548_v60 = vadd.f32 %v2737_v53, %v1547_v59 }
 0x346   :  { %v2106_v61 = vpop.f32.mrf.mxu0 }
 0x347   :  { %1673 = vst.msk [vmem:[%s2911_s12 + $0x8] sm:$0xff] %vm1671_vm2, %v1548_v60  ;;  %v1569_v62 = vadd.f32 %v2106_v61, %v2737_v53 }
 0x348   :  { %v1560_v63 = vpop.f32.mrf.mxu0 }
 0x349   :  { %1678 = vst.msk [vmem:[%s2911_s12 + $0x30] sm:$0xff] %vm1671_vm2, %v1569_v62  ;;  %v1561_v14 = vadd.f32 %v2737_v53, %v1560_v63 }
 0x34a   :  { %v2107_v0 = vpop.f32.mrf.mxu0 }
 0x34b   :  { %1676 = vst.msk [vmem:[%s2911_s12 + $0x20] sm:$0xff] %vm1671_vm2, %v1561_v14  ;;  %v1572_v1 = vadd.f32 %v2107_v0, %v2737_v53 }
 0x34c   :  { %v1563_v2 = vpop.f32.mrf.mxu0 }
 0x34d   :  { %1679 = vst.msk [vmem:[%s2911_s12 + $0x38] sm:$0xff] %vm1671_vm2, %v1572_v1  ;;  %v1564_v3 = vadd.f32 %v2737_v53, %v1563_v2 }
 0x34e   :  { %v2110_v5 = vpop.f32.mrf.mxu0 }
 0x34f   :  { %1677 = vst.msk [vmem:[%s2911_s12 + $0x28] sm:$0xff] %vm1671_vm2, %v1564_v3  ;;  %v1585_v6 = vadd.f32 %v2110_v5, %v2737_v53 }
 0x350   :  { %v1576_v7 = vpop.f32.mrf.mxu0 }
 0x351   :  { %1682 = vst.msk [vmem:[%s2911_s12 + $0x50] sm:$0xff] %vm1671_vm2, %v1585_v6  ;;  %v1577_v8 = vadd.f32 %v2737_v53, %v1576_v7 }
 0x352   :  { %v2111_v33 = vpop.f32.mrf.mxu0 }
 0x353   :  { %1680 = vst.msk [vmem:[%s2911_s12 + $0x40] sm:$0xff] %vm1671_vm2, %v1577_v8  ;;  %v1588_v9 = vadd.f32 %v2111_v33, %v2737_v53 }
 0x354   :  { %v1579_v10 = vpop.f32.mrf.mxu0 }
 0x355   :  { %1683 = vst.msk [vmem:[%s2911_s12 + $0x58] sm:$0xff] %vm1671_vm2, %v1588_v9  ;;  %v1580_v12 = vadd.f32 %v2737_v53, %v1579_v10 }
 0x356   :  { %v2114_v11 = vpop.f32.mrf.mxu1 }
 0x357   :  { %1681 = vst.msk [vmem:[%s2911_s12 + $0x48] sm:$0xff] %vm1671_vm2, %v1580_v12  ;;  %v1601_v13 = vadd.f32 %v2114_v11, %v2737_v53 }
 0x358   :  { %v1592_v15 = vpop.f32.mrf.mxu1 }
 0x359   :  { %1686 = vst.msk [vmem:[%s2911_s12 + $0x70] sm:$0xff] %vm1671_vm2, %v1601_v13  ;;  %v1593_v16 = vadd.f32 %v2737_v53, %v1592_v15 }
 0x35a   :  { %v2115_v17 = vpop.f32.mrf.mxu1 }
 0x35b   :  { %1684 = vst.msk [vmem:[%s2911_s12 + $0x60] sm:$0xff] %vm1671_vm2, %v1593_v16  ;;  %v1604_v18 = vadd.f32 %v2115_v17, %v2737_v53 }
 0x35c   :  { %v1595_v19 = vpop.f32.mrf.mxu1 }
 0x35d   :  { %1687 = vst.msk [vmem:[%s2911_s12 + $0x78] sm:$0xff] %vm1671_vm2, %v1604_v18  ;;  %v1596_v20 = vadd.f32 %v2737_v53, %v1595_v19 }
 0x35e   :  { %v2118_v21 = vpop.f32.mrf.mxu1 }
 0x35f   :  { %1685 = vst.msk [vmem:[%s2911_s12 + $0x68] sm:$0xff] %vm1671_vm2, %v1596_v20  ;;  %v1617_v22 = vadd.f32 %v2118_v21, %v2737_v53 }
 0x360   :  { %v1608_v23 = vpop.f32.mrf.mxu1 }
 0x361   :  { %1690 = vst.msk [vmem:[%s2911_s12 + $0x90] sm:$0xff] %vm1671_vm2, %v1617_v22  ;;  %v1609_v24 = vadd.f32 %v2737_v53, %v1608_v23 }
 0x362   :  { %v2119_v25 = vpop.f32.mrf.mxu1 }
 0x363   :  { %1688 = vst.msk [vmem:[%s2911_s12 + $0x80] sm:$0xff] %vm1671_vm2, %v1609_v24  ;;  %v1620_v26 = vadd.f32 %v2119_v25, %v2737_v53 }
 0x364   :  { %v1611_v27 = vpop.f32.mrf.mxu1 }
 0x365   :  { %1691 = vst.msk [vmem:[%s2911_s12 + $0x98] sm:$0xff] %vm1671_vm2, %v1620_v26  ;;  %v1612_v28 = vadd.f32 %v2737_v53, %v1611_v27 }
 0x366   :  { %v2122_v29 = vpop.f32.mrf.mxu1 }
 0x367   :  { %1689 = vst.msk [vmem:[%s2911_s12 + $0x88] sm:$0xff] %vm1671_vm2, %v1612_v28  ;;  %v1633_v30 = vadd.f32 %v2122_v29, %v2737_v53 }
 0x368   :  { %v1624_v31 = vpop.f32.mrf.mxu1 }
 0x369   :  { %1694 = vst.msk [vmem:[%s2911_s12 + $0xb0] sm:$0xff] %vm1671_vm2, %v1633_v30  ;;  %v1625_v32 = vadd.f32 %v2737_v53, %v1624_v31 }
 0x36a   :  { %v2123_v34 = vpop.f32.mrf.mxu1 }
 0x36b   :  { %1692 = vst.msk [vmem:[%s2911_s12 + $0xa0] sm:$0xff] %vm1671_vm2, %v1625_v32  ;;  %v1636_v35 = vadd.f32 %v2123_v34, %v2737_v53 }
 0x36c   :  { %v1627_v36 = vpop.f32.mrf.mxu1 }
 0x36d   :  { %1695 = vst.msk [vmem:[%s2911_s12 + $0xb8] sm:$0xff] %vm1671_vm2, %v1636_v35  ;;  %v1628_v37 = vadd.f32 %v2737_v53, %v1627_v36 }
 0x36e   :  { %v2126_v38 = vpop.f32.mrf.mxu1 }
 0x36f   :  { %1693 = vst.msk [vmem:[%s2911_s12 + $0xa8] sm:$0xff] %vm1671_vm2, %v1628_v37  ;;  %v1649_v39 = vadd.f32 %v2126_v38, %v2737_v53 }
 0x370   :  { %v1640_v40 = vpop.f32.mrf.mxu1 }
 0x371   :  { %1698 = vst.msk [vmem:[%s2911_s12 + $0xd0] sm:$0xff] %vm1671_vm2, %v1649_v39  ;;  %v1641_v41 = vadd.f32 %v2737_v53, %v1640_v40 }
 0x372   :  { %v2127_v42 = vpop.f32.mrf.mxu1 }
 0x373   :  { %1696 = vst.msk [vmem:[%s2911_s12 + $0xc0] sm:$0xff] %vm1671_vm2, %v1641_v41  ;;  %v1652_v43 = vadd.f32 %v2127_v42, %v2737_v53 }
 0x374   :  { %v1643_v44 = vpop.f32.mrf.mxu1 }
 0x375   :  { %1699 = vst.msk [vmem:[%s2911_s12 + $0xd8] sm:$0xff] %vm1671_vm2, %v1652_v43  ;;  %v1644_v45 = vadd.f32 %v2737_v53, %v1643_v44 }
 0x376   :  { %v2130_v46 = vpop.f32.mrf.mxu1 }
 0x377   :  { %1697 = vst.msk [vmem:[%s2911_s12 + $0xc8] sm:$0xff] %vm1671_vm2, %v1644_v45  ;;  %v1665_v47 = vadd.f32 %v2130_v46, %v2737_v53 }
 0x378   :  { %v1656_v48 = vpop.f32.mrf.mxu1 }
 0x379   :  { %1702 = vst.msk [vmem:[%s2911_s12 + $0xf0] sm:$0xff] %vm1671_vm2, %v1665_v47  ;;  %v1657_v49 = vadd.f32 %v2737_v53, %v1656_v48 }
 0x37a   :  { %v2131_v50 = vpop.f32.mrf.mxu1 }
 0x37b   :  { %1700 = vst.msk [vmem:[%s2911_s12 + $0xe0] sm:$0xff] %vm1671_vm2, %v1657_v49  ;;  %v1668_v51 = vadd.f32 %v2131_v50, %v2737_v53 }
 0x37c   :  { %v1659_v52 = vpop.f32.mrf.mxu1 }
 0x37d   :  { %1703 = vst.msk [vmem:[%s2911_s12 + $0xf8] sm:$0xff] %vm1671_vm2, %v1668_v51  ;;  %v1660_v54 = vadd.f32 %v2737_v53, %v1659_v52 }
 0x37f   :  { %1701 = vst.msk [vmem:[%s2911_s12 + $0xe8] sm:$0xff] %vm1671_vm2, %v1660_v54 }

</bundles_post_ra>
